<compile_context>
chip_gen: v6e
topology: v6e:2x2x1
jax: 0.10.0
libtpu: 0.0.40
codegen_flags: <defaults>
</compile_context>

<pallas_src>
import functools

import jax
import jax.numpy as jnp
from jax.experimental import pallas as pl
from jax.experimental.pallas import tpu as pltpu

EMB = 100            # nn.LSTM(100, ...)
EP = 128             # embedding dim padded to lane width
HID = 50 // 2        # per-direction hidden size (bidirectional -> 50 total)
HP = 64              # padded per-direction hidden
GW = 2 * HP          # 128: one gate block = [fwd 64 | rev 64] lanes
WG = 4 * GW          # 512: fused gate width (packed gate order i, f, o, g)
OUT_PAD = 128        # padded output lane width

# packed gate block -> PyTorch gate row-block (PyTorch order is i, f, g, o)
GATE_ORDER = (0, 1, 3, 2)   # packed blocks hold [i, f, o, g]


def _bert_kernel(x_ref, name_ref, wih_ref, whh_ref, ball_ref, hw_ref, hb_ref,
                 out_ref, xp_ref, *, batch_pad, out_features):
    Bp = batch_pad
    S = x_ref.shape[0] // Bp

    def row(t):
        start = t * Bp if isinstance(t, int) else pl.multiple_of(t * Bp, Bp)
        return pl.ds(start, Bp)

    # ---- hoisted input projection for ALL timesteps & BOTH directions ----
    # (S*Bp, EP) bf16 @ (EP, WG) bf16 -> f32, bias folded once, stored bf16.
    xp_ref[...] = (jnp.dot(x_ref[...], wih_ref[...],
                           preferred_element_type=jnp.float32)
                   + ball_ref[...]).astype(jnp.bfloat16)

    # ---- time-reverse the reverse-direction lanes once (pairwise swap) ----
    lane = jax.lax.broadcasted_iota(jnp.int32, (Bp, WG), 1)
    fwd_mask = (lane & (GW - 1)) < HP          # fwd half of every gate block
    for t in range(S // 2):                    # S is small/static here
        a = xp_ref[row(t), :]
        b = xp_ref[row(S - 1 - t), :]
        xp_ref[row(t), :] = jnp.where(fwd_mask, a, b)
        xp_ref[row(S - 1 - t), :] = jnp.where(fwd_mask, b, a)

    # ---- fused bidirectional LSTM recurrence ----
    def step(t, carry):
        h, c, acc = carry
        px = xp_ref[row(t), :].astype(jnp.float32)          # (Bp, WG)
        # single fused recurrent matmul per step; whh read from VMEM each step
        pre = px + jnp.dot(h.astype(jnp.bfloat16), whh_ref[...],
                           preferred_element_type=jnp.float32)
        sig = jax.nn.sigmoid(pre[:, 0:3 * GW])               # [i | f | o]
        gi = sig[:, 0 * GW:1 * GW]
        gf = sig[:, 1 * GW:2 * GW]
        go = sig[:, 2 * GW:3 * GW]
        gg = jnp.tanh(pre[:, 3 * GW:4 * GW])
        c = gf * c + gi * gg
        h = go * jnp.tanh(c)
        return h, c, acc + h

    h0 = jnp.zeros((Bp, GW), jnp.float32)      # [h_fwd | h_rev]
    c0 = jnp.zeros((Bp, GW), jnp.float32)
    a0 = jnp.zeros((Bp, GW), jnp.float32)
    if S <= 16:
        carry = (h0, c0, a0)
        for t in range(S):
            carry = step(t, carry)
    else:
        carry = jax.lax.fori_loop(0, S, step, (h0, c0, a0), unroll=2)
    _, _, acc = carry

    lstm_mean = (acc * (1.0 / S)).astype(jnp.bfloat16)                 # (Bp, GW)
    name_mean = jnp.mean(name_ref[...].astype(jnp.float32),
                         axis=1).astype(jnp.bfloat16)                  # (Bp, EP)

    # ---- MLP head (weights packed in one padded slab, all blocks x128) ----
    hb = hb_ref[...]
    feat = jnp.concatenate([name_mean, lstm_mean], axis=1)             # (Bp, 256)
    h1 = jnp.maximum(
        jnp.dot(feat, hw_ref[pl.ds(0, 256), :],
                preferred_element_type=jnp.float32) + hb[0:1, :], 0.0)
    # TODO(synk): nn.Dropout(0.1) layers are identity in eval mode; no RNG drop applied.
    h2 = jnp.maximum(jnp.dot(h1.astype(jnp.bfloat16), hw_ref[pl.ds(256, 128), :],
                             preferred_element_type=jnp.float32) + hb[1:2, :], 0.0)
    h3 = jnp.maximum(jnp.dot(h2.astype(jnp.bfloat16), hw_ref[pl.ds(384, 128), :],
                             preferred_element_type=jnp.float32) + hb[2:3, :], 0.0)
    logits = jnp.dot(h3.astype(jnp.bfloat16), hw_ref[pl.ds(512, 128), :],
                     preferred_element_type=jnp.float32) + hb[3:4, :]

    out_lane = jax.lax.broadcasted_iota(jnp.int32, (Bp, OUT_PAD), 1)
    logits = jnp.where(out_lane < out_features, logits, -1e30)  # mask BEFORE max
    z = logits - jnp.max(logits, axis=1, keepdims=True)
    e = jnp.exp(z)
    out_ref[...] = e / jnp.sum(e, axis=1, keepdims=True)   # exact normalization


def init_params(key, vocab_size, out_features):
    assert out_features <= OUT_PAD
    ks = jax.random.split(key, 16)
    s = 0.1

    def n(k, shape):
        return jax.random.normal(k, shape, jnp.float32) * s

    # --- raw parameters in PyTorch layout ---
    emb = n(ks[0], (vocab_size, EMB))
    lstm = {}
    for d, base in (("f", 1), ("r", 5)):
        lstm[d] = dict(
            w_ih=n(ks[base + 0], (4 * HID, EMB)),     # (4H, E)
            w_hh=n(ks[base + 1], (4 * HID, HID)),     # (4H, H)
            b=n(ks[base + 2], (4 * HID,)) + n(ks[base + 3], (4 * HID,)),
        )
    w1 = n(ks[9], (64, 150));  b1 = n(ks[10], (64,))
    w2 = n(ks[11], (32, 64));  b2 = n(ks[12], (32,))
    w3 = n(ks[13], (16, 32));  b3 = n(ks[14], (16,))
    w4 = n(ks[15], (out_features, 16))
    b4 = jnp.zeros((out_features,), jnp.float32)

    # --- pack into kernel layout ---
    # Embedding stored padded to 128 lanes in bf16 so the wrapper gather emits
    # the kernel input layout directly.
    p = {"embedding": jnp.pad(emb, ((0, 0), (0, EP - EMB))).astype(jnp.bfloat16)}

    wih = jnp.zeros((EP, WG), jnp.float32)     # fused input->gate weights
    whh = jnp.zeros((GW, WG), jnp.float32)     # block-diag recurrent weights
    ball = jnp.zeros((1, WG), jnp.float32)     # combined b_ih + b_hh
    for di, d in enumerate(("f", "r")):
        for g_blk, g_pt in enumerate(GATE_ORDER):   # packed order i, f, o, g
            col = g_blk * GW + di * HP
            wih = wih.at[:EMB, col:col + HID].set(
                lstm[d]["w_ih"][g_pt * HID:(g_pt + 1) * HID, :].T)
            whh = whh.at[di * HP:di * HP + HID, col:col + HID].set(
                lstm[d]["w_hh"][g_pt * HID:(g_pt + 1) * HID, :].T)
            ball = ball.at[0, col:col + HID].set(
                lstm[d]["b"][g_pt * HID:(g_pt + 1) * HID])
    p["wih"] = wih.astype(jnp.bfloat16)
    p["whh"] = whh.astype(jnp.bfloat16)
    p["b_all"] = ball

    # MLP head slab: 5 blocks of (128, 128), bf16.
    # Rows 0:128 = name block, rows 128:256 = lstm block (fwd|rev), so the
    # fused first layer multiplies concat([name_mean, lstm_mean]) by rows 0:256.
    w1T = w1.T                                  # (150, 64): [name|lstm_f|lstm_r]
    hw = jnp.zeros((5 * 128, 128), jnp.float32)
    hw = hw.at[0:EMB, 0:64].set(w1T[0:EMB])                                      # name
    hw = hw.at[128:128 + HID, 0:64].set(w1T[EMB:EMB + HID])                      # lstm fwd
    hw = hw.at[128 + HP:128 + HP + HID, 0:64].set(w1T[EMB + HID:EMB + 2 * HID])  # lstm rev
    hw = hw.at[256:256 + 64, 0:32].set(w2.T)
    hw = hw.at[384:384 + 32, 0:16].set(w3.T)
    hw = hw.at[512:512 + 16, 0:out_features].set(w4.T)
    p["head_w"] = hw.astype(jnp.bfloat16)

    hb = jnp.zeros((8, 128), jnp.float32)
    hb = hb.at[0, 0:64].set(b1)
    hb = hb.at[1, 0:32].set(b2)
    hb = hb.at[2, 0:16].set(b3)
    hb = hb.at[3, 0:out_features].set(b4)
    p["head_b"] = hb
    return p


@functools.partial(jax.jit, static_argnames=("out_features",))
def bert_forward(t, t1, params, out_features):
    emb = params["embedding"]                              # (V, 128) bf16
    B, S = t.shape
    B_pad = ((B + 7) // 8) * 8                             # sublane-pad batch
    pad = B_pad - B

    # Single bf16 time-major gather: pad the (tiny) id tensors, transpose ids,
    # gather straight into the kernel layout (no pad/transpose/cast of floats).
    t_pad = jnp.pad(t, ((0, pad), (0, 0)))                 # (B_pad, S) int32
    x2d = jnp.take(emb, t_pad.T.reshape(-1), axis=0)       # (S*B_pad, 128) bf16
    t1_pad = jnp.pad(jnp.squeeze(t1, axis=1), ((0, pad), (0, 0)))
    name = jnp.take(emb, t1_pad, axis=0)                   # (B_pad, S1, 128) bf16
    S1 = name.shape[1]

    args = (x2d, name, params["wih"], params["whh"], params["b_all"],
            params["head_w"], params["head_b"])

    vmem = pl.BlockSpec(memory_space=pltpu.MemorySpace.VMEM)
    kernel = functools.partial(_bert_kernel, batch_pad=B_pad,
                               out_features=out_features)

    # Advisory cost estimate so XLA schedules the gathers / output slice around
    # the custom call instead of serializing on it.
    flops = (2 * S * B_pad * EP * WG            # hoisted input projection
             + 2 * S * B_pad * GW * WG          # recurrent matmuls
             + 10 * S * B_pad * WG              # gate/cell elementwise
             + 2 * B_pad * (256 * 128 + 3 * 128 * 128))   # MLP head
    transcendentals = 5 * GW * B_pad * S + B_pad * OUT_PAD
    bytes_accessed = (x2d.size * 2 + name.size * 2
                      + params["wih"].size * 2 + params["whh"].size * 2
                      + params["b_all"].size * 4
                      + params["head_w"].size * 2 + params["head_b"].size * 4
                      + B_pad * OUT_PAD * 4)

    # NOTE: for large batches on v7x, add a batch-parallel grid
    # (dimension_semantics=("parallel",)) so both TensorCores are used, keep
    # constant index maps (lambda b: (0, 0)) on the weight inputs so they stay
    # resident in VMEM across grid steps, and size the batch tile so
    # {x2d tile + bf16 xp scratch + weights} x double-buffering stays under the
    # vmem limit below. With B_pad=8 there is a single block so no grid is needed.
    out = pl.pallas_call(
        kernel,
        out_shape=jax.ShapeDtypeStruct((B_pad, OUT_PAD), jnp.float32),
        in_specs=[vmem] * len(args),
        out_specs=vmem,
        scratch_shapes=[pltpu.VMEM((S * B_pad, WG), jnp.bfloat16)],
        compiler_params=pltpu.CompilerParams(
            vmem_limit_bytes=32 * 1024 * 1024),
        cost_estimate=pl.CostEstimate(flops=flops,
                                      transcendentals=transcendentals,
                                      bytes_accessed=bytes_accessed),
    )(*args)
    return out[:B, :out_features]


if __name__ == "__main__":
    key = jax.random.PRNGKey(0)
    k_par, k_t, k_t1 = jax.random.split(key, 3)

    VOCAB = 64
    B, S, S1 = 2, 8, 6
    OUT_FEATURES = 4

    params = init_params(k_par, VOCAB, OUT_FEATURES)
    t = jax.random.randint(k_t, (B, S), 0, VOCAB, dtype=jnp.int32)
    t1 = jax.random.randint(k_t1, (B, 1, S1), 0, VOCAB, dtype=jnp.int32)

    out = bert_forward(t, t1, params, OUT_FEATURES)
    out = jax.block_until_ready(out)
    assert out.shape == (B, OUT_FEATURES)
    assert bool(jnp.all(jnp.isfinite(out)))
    assert bool(jnp.all(jnp.abs(jnp.sum(out, axis=1) - 1.0) < 1e-3))
    print("KERNEL_OK")
</pallas_src>

<mosaic_0001>
module attributes {stable_mosaic.version = 11 : i64} {
  func.func @_bert_kernel(%arg0: memref<64x128xbf16, #tpu.memory_space<vmem>>, %arg1: memref<8x6x128xbf16, #tpu.memory_space<vmem>>, %arg2: memref<128x512xbf16, #tpu.memory_space<vmem>>, %arg3: memref<128x512xbf16, #tpu.memory_space<vmem>>, %arg4: memref<1x512xf32, #tpu.memory_space<vmem>>, %arg5: memref<640x128xbf16, #tpu.memory_space<vmem>>, %arg6: memref<8x128xf32, #tpu.memory_space<vmem>>, %arg7: memref<8x128xf32, #tpu.memory_space<vmem>>, %arg8: memref<64x512xbf16, #tpu.memory_space<vmem>>) attributes {dimension_semantics = [], scalar_prefetch = 0 : i64, scratch_operands = 1 : i64, tpu.core_type = #tpu.core_type<tc>} {
    %c0 = arith.constant 0 : index
    %c0_0 = arith.constant 0 : index
    %0 = vector.load %arg0[%c0, %c0_0] : memref<64x128xbf16, #tpu.memory_space<vmem>>, vector<64x128xbf16>
    %c0_1 = arith.constant 0 : index
    %c0_2 = arith.constant 0 : index
    %1 = vector.load %arg2[%c0_1, %c0_2] : memref<128x512xbf16, #tpu.memory_space<vmem>>, vector<128x512xbf16>
    %cst = arith.constant dense<0.000000e+00> : vector<64x512xf32>
    %2 = tpu.matmul %0, %1, %cst {dimension_numbers = #tpu.dot_dimension_numbers<[1], [0], [0], [1], [0, 0, 1, 1], [], []>} : vector<64x128xbf16>, vector<128x512xbf16>, vector<64x512xf32> -> vector<64x512xf32>
    %c0_3 = arith.constant 0 : index
    %c0_4 = arith.constant 0 : index
    %3 = vector.load %arg4[%c0_3, %c0_4] : memref<1x512xf32, #tpu.memory_space<vmem>>, vector<1x512xf32>
    %4 = vector.broadcast %3 : vector<1x512xf32> to vector<64x512xf32>
    %5 = arith.addf %2, %4 : vector<64x512xf32>
    %6 = arith.truncf %5 : vector<64x512xf32> to vector<64x512xbf16>
    %c0_5 = arith.constant 0 : index
    %c0_6 = arith.constant 0 : index
    %7 = vector.load %arg8[%c0_5, %c0_6] : memref<64x512xbf16, #tpu.memory_space<vmem>>, vector<64x512xbf16>
    tpu.vector_store %arg8[%c0_5, %c0_6], %6 {strides = array<i32>} : memref<64x512xbf16, #tpu.memory_space<vmem>>, vector<64x512xbf16>,
    %8 = tpu.iota {dimensions = array<i32: 1>} : vector<8x512xi32>
    %c127_i32 = arith.constant 127 : i32
    %9 = vector.broadcast %c127_i32 : i32 to vector<8x512xi32>
    %10 = arith.andi %8, %9 : vector<8x512xi32>
    %c64_i32 = arith.constant 64 : i32
    %11 = vector.broadcast %c64_i32 : i32 to vector<8x512xi32>
    %12 = arith.cmpi slt, %10, %11 : vector<8x512xi32>
    %c0_7 = arith.constant 0 : index
    %c0_8 = arith.constant 0 : index
    %13 = vector.load %arg8[%c0_7, %c0_8] : memref<64x512xbf16, #tpu.memory_space<vmem>>, vector<8x512xbf16>
    %c56 = arith.constant 56 : index
    %c0_9 = arith.constant 0 : index
    %14 = vector.load %arg8[%c56, %c0_9] : memref<64x512xbf16, #tpu.memory_space<vmem>>, vector<8x512xbf16>
    %15 = arith.select %12, %13, %14 : vector<8x512xi1>, vector<8x512xbf16>
    %c0_10 = arith.constant 0 : index
    %c0_11 = arith.constant 0 : index
    %16 = vector.load %arg8[%c0_10, %c0_11] : memref<64x512xbf16, #tpu.memory_space<vmem>>, vector<8x512xbf16>
    tpu.vector_store %arg8[%c0_10, %c0_11], %15 {strides = array<i32>} : memref<64x512xbf16, #tpu.memory_space<vmem>>, vector<8x512xbf16>,
    %17 = arith.select %12, %14, %13 : vector<8x512xi1>, vector<8x512xbf16>
    %c56_12 = arith.constant 56 : index
    %c0_13 = arith.constant 0 : index
    %18 = vector.load %arg8[%c56_12, %c0_13] : memref<64x512xbf16, #tpu.memory_space<vmem>>, vector<8x512xbf16>
    tpu.vector_store %arg8[%c56_12, %c0_13], %17 {strides = array<i32>} : memref<64x512xbf16, #tpu.memory_space<vmem>>, vector<8x512xbf16>,
    %c8 = arith.constant 8 : index
    %c0_14 = arith.constant 0 : index
    %19 = vector.load %arg8[%c8, %c0_14] : memref<64x512xbf16, #tpu.memory_space<vmem>>, vector<8x512xbf16>
    %c48 = arith.constant 48 : index
    %c0_15 = arith.constant 0 : index
    %20 = vector.load %arg8[%c48, %c0_15] : memref<64x512xbf16, #tpu.memory_space<vmem>>, vector<8x512xbf16>
    %21 = arith.select %12, %19, %20 : vector<8x512xi1>, vector<8x512xbf16>
    %c8_16 = arith.constant 8 : index
    %c0_17 = arith.constant 0 : index
    %22 = vector.load %arg8[%c8_16, %c0_17] : memref<64x512xbf16, #tpu.memory_space<vmem>>, vector<8x512xbf16>
    tpu.vector_store %arg8[%c8_16, %c0_17], %21 {strides = array<i32>} : memref<64x512xbf16, #tpu.memory_space<vmem>>, vector<8x512xbf16>,
    %23 = arith.select %12, %20, %19 : vector<8x512xi1>, vector<8x512xbf16>
    %c48_18 = arith.constant 48 : index
    %c0_19 = arith.constant 0 : index
    %24 = vector.load %arg8[%c48_18, %c0_19] : memref<64x512xbf16, #tpu.memory_space<vmem>>, vector<8x512xbf16>
    tpu.vector_store %arg8[%c48_18, %c0_19], %23 {strides = array<i32>} : memref<64x512xbf16, #tpu.memory_space<vmem>>, vector<8x512xbf16>,
    %c16 = arith.constant 16 : index
    %c0_20 = arith.constant 0 : index
    %25 = vector.load %arg8[%c16, %c0_20] : memref<64x512xbf16, #tpu.memory_space<vmem>>, vector<8x512xbf16>
    %c40 = arith.constant 40 : index
    %c0_21 = arith.constant 0 : index
    %26 = vector.load %arg8[%c40, %c0_21] : memref<64x512xbf16, #tpu.memory_space<vmem>>, vector<8x512xbf16>
    %27 = arith.select %12, %25, %26 : vector<8x512xi1>, vector<8x512xbf16>
    %c16_22 = arith.constant 16 : index
    %c0_23 = arith.constant 0 : index
    %28 = vector.load %arg8[%c16_22, %c0_23] : memref<64x512xbf16, #tpu.memory_space<vmem>>, vector<8x512xbf16>
    tpu.vector_store %arg8[%c16_22, %c0_23], %27 {strides = array<i32>} : memref<64x512xbf16, #tpu.memory_space<vmem>>, vector<8x512xbf16>,
    %29 = arith.select %12, %26, %25 : vector<8x512xi1>, vector<8x512xbf16>
    %c40_24 = arith.constant 40 : index
    %c0_25 = arith.constant 0 : index
    %30 = vector.load %arg8[%c40_24, %c0_25] : memref<64x512xbf16, #tpu.memory_space<vmem>>, vector<8x512xbf16>
    tpu.vector_store %arg8[%c40_24, %c0_25], %29 {strides = array<i32>} : memref<64x512xbf16, #tpu.memory_space<vmem>>, vector<8x512xbf16>,
    %c24 = arith.constant 24 : index
    %c0_26 = arith.constant 0 : index
    %31 = vector.load %arg8[%c24, %c0_26] : memref<64x512xbf16, #tpu.memory_space<vmem>>, vector<8x512xbf16>
    %c32 = arith.constant 32 : index
    %c0_27 = arith.constant 0 : index
    %32 = vector.load %arg8[%c32, %c0_27] : memref<64x512xbf16, #tpu.memory_space<vmem>>, vector<8x512xbf16>
    %33 = arith.select %12, %31, %32 : vector<8x512xi1>, vector<8x512xbf16>
    %c24_28 = arith.constant 24 : index
    %c0_29 = arith.constant 0 : index
    %34 = vector.load %arg8[%c24_28, %c0_29] : memref<64x512xbf16, #tpu.memory_space<vmem>>, vector<8x512xbf16>
    tpu.vector_store %arg8[%c24_28, %c0_29], %33 {strides = array<i32>} : memref<64x512xbf16, #tpu.memory_space<vmem>>, vector<8x512xbf16>,
    %35 = arith.select %12, %32, %31 : vector<8x512xi1>, vector<8x512xbf16>
    %c32_30 = arith.constant 32 : index
    %c0_31 = arith.constant 0 : index
    %36 = vector.load %arg8[%c32_30, %c0_31] : memref<64x512xbf16, #tpu.memory_space<vmem>>, vector<8x512xbf16>
    tpu.vector_store %arg8[%c32_30, %c0_31], %35 {strides = array<i32>} : memref<64x512xbf16, #tpu.memory_space<vmem>>, vector<8x512xbf16>,
    %cst_32 = arith.constant 0.000000e+00 : f32
    %37 = vector.broadcast %cst_32 : f32 to vector<8x128xf32>
    %cst_33 = arith.constant 0.000000e+00 : f32
    %38 = vector.broadcast %cst_33 : f32 to vector<8x128xf32>
    %cst_34 = arith.constant 0.000000e+00 : f32
    %39 = vector.broadcast %cst_34 : f32 to vector<8x128xf32>
    %c0_35 = arith.constant 0 : index
    %c0_36 = arith.constant 0 : index
    %40 = vector.load %arg8[%c0_35, %c0_36] : memref<64x512xbf16, #tpu.memory_space<vmem>>, vector<8x512xbf16>
    %41 = arith.extf %40 : vector<8x512xbf16> to vector<8x512xf32>
    %42 = arith.truncf %37 : vector<8x128xf32> to vector<8x128xbf16>
    %c0_37 = arith.constant 0 : index
    %c0_38 = arith.constant 0 : index
    %43 = vector.load %arg3[%c0_37, %c0_38] : memref<128x512xbf16, #tpu.memory_space<vmem>>, vector<128x512xbf16>
    %cst_39 = arith.constant dense<0.000000e+00> : vector<8x512xf32>
    %44 = tpu.matmul %42, %43, %cst_39 {dimension_numbers = #tpu.dot_dimension_numbers<[1], [0], [0], [1], [0, 0, 1, 1], [], []>} : vector<8x128xbf16>, vector<128x512xbf16>, vector<8x512xf32> -> vector<8x512xf32>
    %45 = arith.addf %41, %44 : vector<8x512xf32>
    %46 = vector.extract_strided_slice %45 {offsets = [0, 0], sizes = [8, 384], strides = [1, 1]} : vector<8x512xf32> to vector<8x384xf32>
    %47 = arith.negf %46 : vector<8x384xf32>
    %48 = math.exp %47 : vector<8x384xf32>
    %cst_40 = arith.constant 1.000000e+00 : f32
    %49 = vector.broadcast %cst_40 : f32 to vector<8x384xf32>
    %50 = arith.addf %49, %48 : vector<8x384xf32>
    %51 = arith.divf %49, %50 : vector<8x384xf32>
    %52 = vector.extract_strided_slice %51 {offsets = [0, 0], sizes = [8, 128], strides = [1, 1]} : vector<8x384xf32> to vector<8x128xf32>
    %53 = vector.extract_strided_slice %51 {offsets = [0, 128], sizes = [8, 128], strides = [1, 1]} : vector<8x384xf32> to vector<8x128xf32>
    %54 = vector.extract_strided_slice %51 {offsets = [0, 256], sizes = [8, 128], strides = [1, 1]} : vector<8x384xf32> to vector<8x128xf32>
    %55 = vector.extract_strided_slice %45 {offsets = [0, 384], sizes = [8, 128], strides = [1, 1]} : vector<8x512xf32> to vector<8x128xf32>
    %56 = math.tanh %55 : vector<8x128xf32>
    %57 = arith.mulf %53, %38 : vector<8x128xf32>
    %58 = arith.mulf %52, %56 : vector<8x128xf32>
    %59 = arith.addf %57, %58 : vector<8x128xf32>
    %60 = math.tanh %59 : vector<8x128xf32>
    %61 = arith.mulf %54, %60 : vector<8x128xf32>
    %62 = arith.addf %39, %61 : vector<8x128xf32>
    %c8_41 = arith.constant 8 : index
    %c0_42 = arith.constant 0 : index
    %63 = vector.load %arg8[%c8_41, %c0_42] : memref<64x512xbf16, #tpu.memory_space<vmem>>, vector<8x512xbf16>
    %64 = arith.extf %63 : vector<8x512xbf16> to vector<8x512xf32>
    %65 = arith.truncf %61 : vector<8x128xf32> to vector<8x128xbf16>
    %c0_43 = arith.constant 0 : index
    %c0_44 = arith.constant 0 : index
    %66 = vector.load %arg3[%c0_43, %c0_44] : memref<128x512xbf16, #tpu.memory_space<vmem>>, vector<128x512xbf16>
    %cst_45 = arith.constant dense<0.000000e+00> : vector<8x512xf32>
    %67 = tpu.matmul %65, %66, %cst_45 {dimension_numbers = #tpu.dot_dimension_numbers<[1], [0], [0], [1], [0, 0, 1, 1], [], []>} : vector<8x128xbf16>, vector<128x512xbf16>, vector<8x512xf32> -> vector<8x512xf32>
    %68 = arith.addf %64, %67 : vector<8x512xf32>
    %69 = vector.extract_strided_slice %68 {offsets = [0, 0], sizes = [8, 384], strides = [1, 1]} : vector<8x512xf32> to vector<8x384xf32>
    %70 = arith.negf %69 : vector<8x384xf32>
    %71 = math.exp %70 : vector<8x384xf32>
    %cst_46 = arith.constant 1.000000e+00 : f32
    %72 = vector.broadcast %cst_46 : f32 to vector<8x384xf32>
    %73 = arith.addf %72, %71 : vector<8x384xf32>
    %74 = arith.divf %72, %73 : vector<8x384xf32>
    %75 = vector.extract_strided_slice %74 {offsets = [0, 0], sizes = [8, 128], strides = [1, 1]} : vector<8x384xf32> to vector<8x128xf32>
    %76 = vector.extract_strided_slice %74 {offsets = [0, 128], sizes = [8, 128], strides = [1, 1]} : vector<8x384xf32> to vector<8x128xf32>
    %77 = vector.extract_strided_slice %74 {offsets = [0, 256], sizes = [8, 128], strides = [1, 1]} : vector<8x384xf32> to vector<8x128xf32>
    %78 = vector.extract_strided_slice %68 {offsets = [0, 384], sizes = [8, 128], strides = [1, 1]} : vector<8x512xf32> to vector<8x128xf32>
    %79 = math.tanh %78 : vector<8x128xf32>
    %80 = arith.mulf %76, %59 : vector<8x128xf32>
    %81 = arith.mulf %75, %79 : vector<8x128xf32>
    %82 = arith.addf %80, %81 : vector<8x128xf32>
    %83 = math.tanh %82 : vector<8x128xf32>
    %84 = arith.mulf %77, %83 : vector<8x128xf32>
    %85 = arith.addf %62, %84 : vector<8x128xf32>
    %c16_47 = arith.constant 16 : index
    %c0_48 = arith.constant 0 : index
    %86 = vector.load %arg8[%c16_47, %c0_48] : memref<64x512xbf16, #tpu.memory_space<vmem>>, vector<8x512xbf16>
    %87 = arith.extf %86 : vector<8x512xbf16> to vector<8x512xf32>
    %88 = arith.truncf %84 : vector<8x128xf32> to vector<8x128xbf16>
    %c0_49 = arith.constant 0 : index
    %c0_50 = arith.constant 0 : index
    %89 = vector.load %arg3[%c0_49, %c0_50] : memref<128x512xbf16, #tpu.memory_space<vmem>>, vector<128x512xbf16>
    %cst_51 = arith.constant dense<0.000000e+00> : vector<8x512xf32>
    %90 = tpu.matmul %88, %89, %cst_51 {dimension_numbers = #tpu.dot_dimension_numbers<[1], [0], [0], [1], [0, 0, 1, 1], [], []>} : vector<8x128xbf16>, vector<128x512xbf16>, vector<8x512xf32> -> vector<8x512xf32>
    %91 = arith.addf %87, %90 : vector<8x512xf32>
    %92 = vector.extract_strided_slice %91 {offsets = [0, 0], sizes = [8, 384], strides = [1, 1]} : vector<8x512xf32> to vector<8x384xf32>
    %93 = arith.negf %92 : vector<8x384xf32>
    %94 = math.exp %93 : vector<8x384xf32>
    %cst_52 = arith.constant 1.000000e+00 : f32
    %95 = vector.broadcast %cst_52 : f32 to vector<8x384xf32>
    %96 = arith.addf %95, %94 : vector<8x384xf32>
    %97 = arith.divf %95, %96 : vector<8x384xf32>
    %98 = vector.extract_strided_slice %97 {offsets = [0, 0], sizes = [8, 128], strides = [1, 1]} : vector<8x384xf32> to vector<8x128xf32>
    %99 = vector.extract_strided_slice %97 {offsets = [0, 128], sizes = [8, 128], strides = [1, 1]} : vector<8x384xf32> to vector<8x128xf32>
    %100 = vector.extract_strided_slice %97 {offsets = [0, 256], sizes = [8, 128], strides = [1, 1]} : vector<8x384xf32> to vector<8x128xf32>
    %101 = vector.extract_strided_slice %91 {offsets = [0, 384], sizes = [8, 128], strides = [1, 1]} : vector<8x512xf32> to vector<8x128xf32>
    %102 = math.tanh %101 : vector<8x128xf32>
    %103 = arith.mulf %99, %82 : vector<8x128xf32>
    %104 = arith.mulf %98, %102 : vector<8x128xf32>
    %105 = arith.addf %103, %104 : vector<8x128xf32>
    %106 = math.tanh %105 : vector<8x128xf32>
    %107 = arith.mulf %100, %106 : vector<8x128xf32>
    %108 = arith.addf %85, %107 : vector<8x128xf32>
    %c24_53 = arith.constant 24 : index
    %c0_54 = arith.constant 0 : index
    %109 = vector.load %arg8[%c24_53, %c0_54] : memref<64x512xbf16, #tpu.memory_space<vmem>>, vector<8x512xbf16>
    %110 = arith.extf %109 : vector<8x512xbf16> to vector<8x512xf32>
    %111 = arith.truncf %107 : vector<8x128xf32> to vector<8x128xbf16>
    %c0_55 = arith.constant 0 : index
    %c0_56 = arith.constant 0 : index
    %112 = vector.load %arg3[%c0_55, %c0_56] : memref<128x512xbf16, #tpu.memory_space<vmem>>, vector<128x512xbf16>
    %cst_57 = arith.constant dense<0.000000e+00> : vector<8x512xf32>
    %113 = tpu.matmul %111, %112, %cst_57 {dimension_numbers = #tpu.dot_dimension_numbers<[1], [0], [0], [1], [0, 0, 1, 1], [], []>} : vector<8x128xbf16>, vector<128x512xbf16>, vector<8x512xf32> -> vector<8x512xf32>
    %114 = arith.addf %110, %113 : vector<8x512xf32>
    %115 = vector.extract_strided_slice %114 {offsets = [0, 0], sizes = [8, 384], strides = [1, 1]} : vector<8x512xf32> to vector<8x384xf32>
    %116 = arith.negf %115 : vector<8x384xf32>
    %117 = math.exp %116 : vector<8x384xf32>
    %cst_58 = arith.constant 1.000000e+00 : f32
    %118 = vector.broadcast %cst_58 : f32 to vector<8x384xf32>
    %119 = arith.addf %118, %117 : vector<8x384xf32>
    %120 = arith.divf %118, %119 : vector<8x384xf32>
    %121 = vector.extract_strided_slice %120 {offsets = [0, 0], sizes = [8, 128], strides = [1, 1]} : vector<8x384xf32> to vector<8x128xf32>
    %122 = vector.extract_strided_slice %120 {offsets = [0, 128], sizes = [8, 128], strides = [1, 1]} : vector<8x384xf32> to vector<8x128xf32>
    %123 = vector.extract_strided_slice %120 {offsets = [0, 256], sizes = [8, 128], strides = [1, 1]} : vector<8x384xf32> to vector<8x128xf32>
    %124 = vector.extract_strided_slice %114 {offsets = [0, 384], sizes = [8, 128], strides = [1, 1]} : vector<8x512xf32> to vector<8x128xf32>
    %125 = math.tanh %124 : vector<8x128xf32>
    %126 = arith.mulf %122, %105 : vector<8x128xf32>
    %127 = arith.mulf %121, %125 : vector<8x128xf32>
    %128 = arith.addf %126, %127 : vector<8x128xf32>
    %129 = math.tanh %128 : vector<8x128xf32>
    %130 = arith.mulf %123, %129 : vector<8x128xf32>
    %131 = arith.addf %108, %130 : vector<8x128xf32>
    %c32_59 = arith.constant 32 : index
    %c0_60 = arith.constant 0 : index
    %132 = vector.load %arg8[%c32_59, %c0_60] : memref<64x512xbf16, #tpu.memory_space<vmem>>, vector<8x512xbf16>
    %133 = arith.extf %132 : vector<8x512xbf16> to vector<8x512xf32>
    %134 = arith.truncf %130 : vector<8x128xf32> to vector<8x128xbf16>
    %c0_61 = arith.constant 0 : index
    %c0_62 = arith.constant 0 : index
    %135 = vector.load %arg3[%c0_61, %c0_62] : memref<128x512xbf16, #tpu.memory_space<vmem>>, vector<128x512xbf16>
    %cst_63 = arith.constant dense<0.000000e+00> : vector<8x512xf32>
    %136 = tpu.matmul %134, %135, %cst_63 {dimension_numbers = #tpu.dot_dimension_numbers<[1], [0], [0], [1], [0, 0, 1, 1], [], []>} : vector<8x128xbf16>, vector<128x512xbf16>, vector<8x512xf32> -> vector<8x512xf32>
    %137 = arith.addf %133, %136 : vector<8x512xf32>
    %138 = vector.extract_strided_slice %137 {offsets = [0, 0], sizes = [8, 384], strides = [1, 1]} : vector<8x512xf32> to vector<8x384xf32>
    %139 = arith.negf %138 : vector<8x384xf32>
    %140 = math.exp %139 : vector<8x384xf32>
    %cst_64 = arith.constant 1.000000e+00 : f32
    %141 = vector.broadcast %cst_64 : f32 to vector<8x384xf32>
    %142 = arith.addf %141, %140 : vector<8x384xf32>
    %143 = arith.divf %141, %142 : vector<8x384xf32>
    %144 = vector.extract_strided_slice %143 {offsets = [0, 0], sizes = [8, 128], strides = [1, 1]} : vector<8x384xf32> to vector<8x128xf32>
    %145 = vector.extract_strided_slice %143 {offsets = [0, 128], sizes = [8, 128], strides = [1, 1]} : vector<8x384xf32> to vector<8x128xf32>
    %146 = vector.extract_strided_slice %143 {offsets = [0, 256], sizes = [8, 128], strides = [1, 1]} : vector<8x384xf32> to vector<8x128xf32>
    %147 = vector.extract_strided_slice %137 {offsets = [0, 384], sizes = [8, 128], strides = [1, 1]} : vector<8x512xf32> to vector<8x128xf32>
    %148 = math.tanh %147 : vector<8x128xf32>
    %149 = arith.mulf %145, %128 : vector<8x128xf32>
    %150 = arith.mulf %144, %148 : vector<8x128xf32>
    %151 = arith.addf %149, %150 : vector<8x128xf32>
    %152 = math.tanh %151 : vector<8x128xf32>
    %153 = arith.mulf %146, %152 : vector<8x128xf32>
    %154 = arith.addf %131, %153 : vector<8x128xf32>
    %c40_65 = arith.constant 40 : index
    %c0_66 = arith.constant 0 : index
    %155 = vector.load %arg8[%c40_65, %c0_66] : memref<64x512xbf16, #tpu.memory_space<vmem>>, vector<8x512xbf16>
    %156 = arith.extf %155 : vector<8x512xbf16> to vector<8x512xf32>
    %157 = arith.truncf %153 : vector<8x128xf32> to vector<8x128xbf16>
    %c0_67 = arith.constant 0 : index
    %c0_68 = arith.constant 0 : index
    %158 = vector.load %arg3[%c0_67, %c0_68] : memref<128x512xbf16, #tpu.memory_space<vmem>>, vector<128x512xbf16>
    %cst_69 = arith.constant dense<0.000000e+00> : vector<8x512xf32>
    %159 = tpu.matmul %157, %158, %cst_69 {dimension_numbers = #tpu.dot_dimension_numbers<[1], [0], [0], [1], [0, 0, 1, 1], [], []>} : vector<8x128xbf16>, vector<128x512xbf16>, vector<8x512xf32> -> vector<8x512xf32>
    %160 = arith.addf %156, %159 : vector<8x512xf32>
    %161 = vector.extract_strided_slice %160 {offsets = [0, 0], sizes = [8, 384], strides = [1, 1]} : vector<8x512xf32> to vector<8x384xf32>
    %162 = arith.negf %161 : vector<8x384xf32>
    %163 = math.exp %162 : vector<8x384xf32>
    %cst_70 = arith.constant 1.000000e+00 : f32
    %164 = vector.broadcast %cst_70 : f32 to vector<8x384xf32>
    %165 = arith.addf %164, %163 : vector<8x384xf32>
    %166 = arith.divf %164, %165 : vector<8x384xf32>
    %167 = vector.extract_strided_slice %166 {offsets = [0, 0], sizes = [8, 128], strides = [1, 1]} : vector<8x384xf32> to vector<8x128xf32>
    %168 = vector.extract_strided_slice %166 {offsets = [0, 128], sizes = [8, 128], strides = [1, 1]} : vector<8x384xf32> to vector<8x128xf32>
    %169 = vector.extract_strided_slice %166 {offsets = [0, 256], sizes = [8, 128], strides = [1, 1]} : vector<8x384xf32> to vector<8x128xf32>
    %170 = vector.extract_strided_slice %160 {offsets = [0, 384], sizes = [8, 128], strides = [1, 1]} : vector<8x512xf32> to vector<8x128xf32>
    %171 = math.tanh %170 : vector<8x128xf32>
    %172 = arith.mulf %168, %151 : vector<8x128xf32>
    %173 = arith.mulf %167, %171 : vector<8x128xf32>
    %174 = arith.addf %172, %173 : vector<8x128xf32>
    %175 = math.tanh %174 : vector<8x128xf32>
    %176 = arith.mulf %169, %175 : vector<8x128xf32>
    %177 = arith.addf %154, %176 : vector<8x128xf32>
    %c48_71 = arith.constant 48 : index
    %c0_72 = arith.constant 0 : index
    %178 = vector.load %arg8[%c48_71, %c0_72] : memref<64x512xbf16, #tpu.memory_space<vmem>>, vector<8x512xbf16>
    %179 = arith.extf %178 : vector<8x512xbf16> to vector<8x512xf32>
    %180 = arith.truncf %176 : vector<8x128xf32> to vector<8x128xbf16>
    %c0_73 = arith.constant 0 : index
    %c0_74 = arith.constant 0 : index
    %181 = vector.load %arg3[%c0_73, %c0_74] : memref<128x512xbf16, #tpu.memory_space<vmem>>, vector<128x512xbf16>
    %cst_75 = arith.constant dense<0.000000e+00> : vector<8x512xf32>
    %182 = tpu.matmul %180, %181, %cst_75 {dimension_numbers = #tpu.dot_dimension_numbers<[1], [0], [0], [1], [0, 0, 1, 1], [], []>} : vector<8x128xbf16>, vector<128x512xbf16>, vector<8x512xf32> -> vector<8x512xf32>
    %183 = arith.addf %179, %182 : vector<8x512xf32>
    %184 = vector.extract_strided_slice %183 {offsets = [0, 0], sizes = [8, 384], strides = [1, 1]} : vector<8x512xf32> to vector<8x384xf32>
    %185 = arith.negf %184 : vector<8x384xf32>
    %186 = math.exp %185 : vector<8x384xf32>
    %cst_76 = arith.constant 1.000000e+00 : f32
    %187 = vector.broadcast %cst_76 : f32 to vector<8x384xf32>
    %188 = arith.addf %187, %186 : vector<8x384xf32>
    %189 = arith.divf %187, %188 : vector<8x384xf32>
    %190 = vector.extract_strided_slice %189 {offsets = [0, 0], sizes = [8, 128], strides = [1, 1]} : vector<8x384xf32> to vector<8x128xf32>
    %191 = vector.extract_strided_slice %189 {offsets = [0, 128], sizes = [8, 128], strides = [1, 1]} : vector<8x384xf32> to vector<8x128xf32>
    %192 = vector.extract_strided_slice %189 {offsets = [0, 256], sizes = [8, 128], strides = [1, 1]} : vector<8x384xf32> to vector<8x128xf32>
    %193 = vector.extract_strided_slice %183 {offsets = [0, 384], sizes = [8, 128], strides = [1, 1]} : vector<8x512xf32> to vector<8x128xf32>
    %194 = math.tanh %193 : vector<8x128xf32>
    %195 = arith.mulf %191, %174 : vector<8x128xf32>
    %196 = arith.mulf %190, %194 : vector<8x128xf32>
    %197 = arith.addf %195, %196 : vector<8x128xf32>
    %198 = math.tanh %197 : vector<8x128xf32>
    %199 = arith.mulf %192, %198 : vector<8x128xf32>
    %200 = arith.addf %177, %199 : vector<8x128xf32>
    %c56_77 = arith.constant 56 : index
    %c0_78 = arith.constant 0 : index
    %201 = vector.load %arg8[%c56_77, %c0_78] : memref<64x512xbf16, #tpu.memory_space<vmem>>, vector<8x512xbf16>
    %202 = arith.extf %201 : vector<8x512xbf16> to vector<8x512xf32>
    %203 = arith.truncf %199 : vector<8x128xf32> to vector<8x128xbf16>
    %c0_79 = arith.constant 0 : index
    %c0_80 = arith.constant 0 : index
    %204 = vector.load %arg3[%c0_79, %c0_80] : memref<128x512xbf16, #tpu.memory_space<vmem>>, vector<128x512xbf16>
    %cst_81 = arith.constant dense<0.000000e+00> : vector<8x512xf32>
    %205 = tpu.matmul %203, %204, %cst_81 {dimension_numbers = #tpu.dot_dimension_numbers<[1], [0], [0], [1], [0, 0, 1, 1], [], []>} : vector<8x128xbf16>, vector<128x512xbf16>, vector<8x512xf32> -> vector<8x512xf32>
    %206 = arith.addf %202, %205 : vector<8x512xf32>
    %207 = vector.extract_strided_slice %206 {offsets = [0, 0], sizes = [8, 384], strides = [1, 1]} : vector<8x512xf32> to vector<8x384xf32>
    %208 = arith.negf %207 : vector<8x384xf32>
    %209 = math.exp %208 : vector<8x384xf32>
    %cst_82 = arith.constant 1.000000e+00 : f32
    %210 = vector.broadcast %cst_82 : f32 to vector<8x384xf32>
    %211 = arith.addf %210, %209 : vector<8x384xf32>
    %212 = arith.divf %210, %211 : vector<8x384xf32>
    %213 = vector.extract_strided_slice %212 {offsets = [0, 0], sizes = [8, 128], strides = [1, 1]} : vector<8x384xf32> to vector<8x128xf32>
    %214 = vector.extract_strided_slice %212 {offsets = [0, 128], sizes = [8, 128], strides = [1, 1]} : vector<8x384xf32> to vector<8x128xf32>
    %215 = vector.extract_strided_slice %212 {offsets = [0, 256], sizes = [8, 128], strides = [1, 1]} : vector<8x384xf32> to vector<8x128xf32>
    %216 = vector.extract_strided_slice %206 {offsets = [0, 384], sizes = [8, 128], strides = [1, 1]} : vector<8x512xf32> to vector<8x128xf32>
    %217 = math.tanh %216 : vector<8x128xf32>
    %218 = arith.mulf %214, %197 : vector<8x128xf32>
    %219 = arith.mulf %213, %217 : vector<8x128xf32>
    %220 = arith.addf %218, %219 : vector<8x128xf32>
    %221 = math.tanh %220 : vector<8x128xf32>
    %222 = arith.mulf %215, %221 : vector<8x128xf32>
    %223 = arith.addf %200, %222 : vector<8x128xf32>
    %cst_83 = arith.constant 1.250000e-01 : f32
    %224 = vector.broadcast %cst_83 : f32 to vector<8x128xf32>
    %225 = arith.mulf %223, %224 : vector<8x128xf32>
    %226 = arith.truncf %225 : vector<8x128xf32> to vector<8x128xbf16>
    %c0_84 = arith.constant 0 : index
    %c0_85 = arith.constant 0 : index
    %c0_86 = arith.constant 0 : index
    %227 = vector.load %arg1[%c0_84, %c0_85, %c0_86] : memref<8x6x128xbf16, #tpu.memory_space<vmem>>, vector<8x6x128xbf16>
    %228 = arith.extf %227 : vector<8x6x128xbf16> to vector<8x6x128xf32>
    %cst_87 = arith.constant dense<0.000000e+00> : vector<8x128xf32>
    %229 = vector.multi_reduction <add>, %228, %cst_87 [1] : vector<8x6x128xf32> to vector<8x128xf32>
    %cst_88 = arith.constant 6.000000e+00 : f32
    %230 = vector.broadcast %cst_88 : f32 to vector<8x128xf32>
    %231 = arith.divf %229, %230 : vector<8x128xf32>
    %232 = arith.truncf %231 : vector<8x128xf32> to vector<8x128xbf16>
    %c0_89 = arith.constant 0 : index
    %c0_90 = arith.constant 0 : index
    %233 = vector.load %arg6[%c0_89, %c0_90] : memref<8x128xf32, #tpu.memory_space<vmem>>, vector<8x128xf32>
    %234 = tpu.concatenate %232, %226 in 1 : vector<8x128xbf16>, vector<8x128xbf16> -> vector<8x256xbf16>
    %c0_91 = arith.constant 0 : index
    %c0_92 = arith.constant 0 : index
    %235 = vector.load %arg5[%c0_91, %c0_92] : memref<640x128xbf16, #tpu.memory_space<vmem>>, vector<256x128xbf16>
    %cst_93 = arith.constant dense<0.000000e+00> : vector<8x128xf32>
    %236 = tpu.matmul %234, %235, %cst_93 {dimension_numbers = #tpu.dot_dimension_numbers<[1], [0], [0], [1], [0, 0, 1, 1], [], []>} : vector<8x256xbf16>, vector<256x128xbf16>, vector<8x128xf32> -> vector<8x128xf32>
    %237 = vector.extract_strided_slice %233 {offsets = [0, 0], sizes = [1, 128], strides = [1, 1]} : vector<8x128xf32> to vector<1x128xf32>
    %238 = vector.broadcast %237 : vector<1x128xf32> to vector<8x128xf32>
    %239 = arith.addf %236, %238 : vector<8x128xf32>
    %cst_94 = arith.constant 0.000000e+00 : f32
    %240 = vector.broadcast %cst_94 : f32 to vector<8x128xf32>
    %241 = arith.maximumf %239, %240 : vector<8x128xf32>
    %242 = arith.truncf %241 : vector<8x128xf32> to vector<8x128xbf16>
    %c256 = arith.constant 256 : index
    %c0_95 = arith.constant 0 : index
    %243 = vector.load %arg5[%c256, %c0_95] : memref<640x128xbf16, #tpu.memory_space<vmem>>, vector<128x128xbf16>
    %cst_96 = arith.constant dense<0.000000e+00> : vector<8x128xf32>
    %244 = tpu.matmul %242, %243, %cst_96 {dimension_numbers = #tpu.dot_dimension_numbers<[1], [0], [0], [1], [0, 0, 1, 1], [], []>} : vector<8x128xbf16>, vector<128x128xbf16>, vector<8x128xf32> -> vector<8x128xf32>
    %245 = vector.extract_strided_slice %233 {offsets = [1, 0], sizes = [1, 128], strides = [1, 1]} : vector<8x128xf32> to vector<1x128xf32>
    %246 = vector.broadcast %245 : vector<1x128xf32> to vector<8x128xf32>
    %247 = arith.addf %244, %246 : vector<8x128xf32>
    %cst_97 = arith.constant 0.000000e+00 : f32
    %248 = vector.broadcast %cst_97 : f32 to vector<8x128xf32>
    %249 = arith.maximumf %247, %248 : vector<8x128xf32>
    %250 = arith.truncf %249 : vector<8x128xf32> to vector<8x128xbf16>
    %c384 = arith.constant 384 : index
    %c0_98 = arith.constant 0 : index
    %251 = vector.load %arg5[%c384, %c0_98] : memref<640x128xbf16, #tpu.memory_space<vmem>>, vector<128x128xbf16>
    %cst_99 = arith.constant dense<0.000000e+00> : vector<8x128xf32>
    %252 = tpu.matmul %250, %251, %cst_99 {dimension_numbers = #tpu.dot_dimension_numbers<[1], [0], [0], [1], [0, 0, 1, 1], [], []>} : vector<8x128xbf16>, vector<128x128xbf16>, vector<8x128xf32> -> vector<8x128xf32>
    %253 = vector.extract_strided_slice %233 {offsets = [2, 0], sizes = [1, 128], strides = [1, 1]} : vector<8x128xf32> to vector<1x128xf32>
    %254 = vector.broadcast %253 : vector<1x128xf32> to vector<8x128xf32>
    %255 = arith.addf %252, %254 : vector<8x128xf32>
    %cst_100 = arith.constant 0.000000e+00 : f32
    %256 = vector.broadcast %cst_100 : f32 to vector<8x128xf32>
    %257 = arith.maximumf %255, %256 : vector<8x128xf32>
    %258 = arith.truncf %257 : vector<8x128xf32> to vector<8x128xbf16>
    %c512 = arith.constant 512 : index
    %c0_101 = arith.constant 0 : index
    %259 = vector.load %arg5[%c512, %c0_101] : memref<640x128xbf16, #tpu.memory_space<vmem>>, vector<128x128xbf16>
    %cst_102 = arith.constant dense<0.000000e+00> : vector<8x128xf32>
    %260 = tpu.matmul %258, %259, %cst_102 {dimension_numbers = #tpu.dot_dimension_numbers<[1], [0], [0], [1], [0, 0, 1, 1], [], []>} : vector<8x128xbf16>, vector<128x128xbf16>, vector<8x128xf32> -> vector<8x128xf32>
    %261 = vector.extract_strided_slice %233 {offsets = [3, 0], sizes = [1, 128], strides = [1, 1]} : vector<8x128xf32> to vector<1x128xf32>
    %262 = vector.broadcast %261 : vector<1x128xf32> to vector<8x128xf32>
    %263 = arith.addf %260, %262 : vector<8x128xf32>
    %264 = tpu.iota {dimensions = array<i32: 1>} : vector<8x128xi32>
    %c4_i32 = arith.constant 4 : i32
    %265 = vector.broadcast %c4_i32 : i32 to vector<8x128xi32>
    %266 = arith.cmpi slt, %264, %265 : vector<8x128xi32>
    %cst_103 = arith.constant -1.000000e+30 : f32
    %267 = vector.broadcast %cst_103 : f32 to vector<8x128xf32>
    %268 = arith.select %266, %263, %267 : vector<8x128xi1>, vector<8x128xf32>
    %cst_104 = arith.constant dense<0xFF800000> : vector<8xf32>
    %269 = vector.multi_reduction <maximumf>, %268, %cst_104 [1] : vector<8x128xf32> to vector<8xf32>
    %270 = vector.shape_cast %269 : vector<8xf32> to vector<8x1xf32>
    %271 = vector.broadcast %270 : vector<8x1xf32> to vector<8x128xf32>
    %272 = arith.subf %268, %271 : vector<8x128xf32>
    %273 = math.exp %272 : vector<8x128xf32>
    %cst_105 = arith.constant dense<0.000000e+00> : vector<8xf32>
    %274 = vector.multi_reduction <add>, %273, %cst_105 [1] : vector<8x128xf32> to vector<8xf32>
    %275 = vector.shape_cast %274 : vector<8xf32> to vector<8x1xf32>
    %276 = vector.broadcast %275 : vector<8x1xf32> to vector<8x128xf32>
    %277 = arith.divf %273, %276 : vector<8x128xf32>
    %c0_106 = arith.constant 0 : index
    %c0_107 = arith.constant 0 : index
    %278 = vector.load %arg7[%c0_106, %c0_107] : memref<8x128xf32, #tpu.memory_space<vmem>>, vector<8x128xf32>
    tpu.vector_store %arg7[%c0_106, %c0_107], %277 {strides = array<i32>} : memref<8x128xf32, #tpu.memory_space<vmem>>, vector<8x128xf32>,
    return
  }
}

</mosaic_0001>

<bundles_post_ra>
// kernel: bert_forward.1
= control target key start
LH: loop header
LB: loop body
LE: loop exit
PB: predicated region body
PF: predicated region fallthrough
CT: control target
= control target key end

     0   :  { %v4154_v1 = vmov 0   ;;  %vm1747_vm6 = vcmask 1045504   ;;  %vm1838_vm7 = vcmask 1041409   ;;  %vm1840_vm8 = vcmask 1042434   ;;  %s4142_s2 = inlined_call_operand.vmem [shape: bf16[128,512], index: 2, kind: input, shape index: {}]   ;;  %s4143_s0 = inlined_call_operand.vmem [shape: bf16[64,128], index: 0, kind: input, shape index: {}]   ;;  %s4144_s3 = inlined_call_operand.vmem [shape: bf16[128,512], index: 3, kind: input, shape index: {}]   ;;  %s4145_s4 = inlined_call_operand.vmem [shape: f32[1,512], index: 4, kind: input, shape index: {}]   ;;  %s4146_s5 = inlined_call_operand.vmem [shape: bf16[640,128], index: 5, kind: input, shape index: {}]   ;;  %s4147_s1 = inlined_call_operand.vmem [shape: bf16[8,6,128], index: 1, kind: input, shape index: {}]   ;;  %s4148_s6 = inlined_call_operand.vmem [shape: f32[8,128], index: 6, kind: input, shape index: {}]   ;;  %s4149_s7 = inlined_call_operand.vmem [shape: f32[8,128], index: 7, kind: output, shape index: {}]  }
   0x1   :  { %v2648_v0 = vld [vmem:[%s4142_s2 + $0xe4] ss:$16 sps:$4 sm:$0xff]   ;;  %305 = vmatprep.mubr.bf16.mxu0 %v4154_v1  ;;  %378 = vmatprep.mubr.bf16.mxu1 %v4154_v1  ;;  %v2650_v2 = vld [vmem:[%s4142_s2 + $0xec] ss:$16 sps:$4 sm:$0xff]   ;;  %v2652_v3 = vld [vmem:[%s4142_s2 + $0xe0] ss:$16 sps:$4 sm:$0xff]  }
   0x2   :  { %273 = vmatprep.subr.bf16.mxu0 %v2648_v0  ;;  %v2653_v4 = vld [vmem:[%s4142_s2 + $0xe8] ss:$16 sps:$4 sm:$0xff]   ;;  %346 = vmatprep.subr.bf16.mxu1 %v2650_v2  ;;  %v2654_v5 = vld [vmem:[%s4142_s2 + $0xc4] ss:$16 sps:$4 sm:$0xff]   ;;  %v2656_v6 = vld [vmem:[%s4142_s2 + $0xcc] ss:$16 sps:$4 sm:$0xff]  }
   0x3   :  { %274 = vmatpush1.bf16.msra.mxu0 %v2652_v3  ;;  %347 = vmatpush1.bf16.msra.mxu1 %v2653_v4  ;;  %v2658_v7 = vld [vmem:[%s4142_s2 + $0xc0] ss:$16 sps:$4 sm:$0xff]   ;;  %v2659_v8 = vld [vmem:[%s4142_s2 + $0xc8] ss:$16 sps:$4 sm:$0xff]   ;;  %v2660_v9 = vld [vmem:[%s4142_s2 + $0xa4] ss:$16 sps:$4 sm:$0xff]  }
   0x4   :  { %275 = vmatprep.subr.bf16.mxu0 %v2654_v5  ;;  %348 = vmatprep.subr.bf16.mxu1 %v2656_v6  ;;  %v2662_v10 = vld [vmem:[%s4142_s2 + $0xac] ss:$16 sps:$4 sm:$0xff]   ;;  %v2664_v11 = vld [vmem:[%s4142_s2 + $0xa0] ss:$16 sps:$4 sm:$0xff]   ;;  %v2665_v12 = vld [vmem:[%s4142_s2 + $0xa8] ss:$16 sps:$4 sm:$0xff]   ;;  %v69_v6 = vlaneseq }
   0x5   :  { %v2666_v13 = vld [vmem:[%s4142_s2 + $0x84] ss:$16 sps:$4 sm:$0xff]   ;;  %v2668_v14 = vld [vmem:[%s4142_s2 + $0x8c] ss:$16 sps:$4 sm:$0xff]   ;;  %v2670_v15 = vld [vmem:[%s4142_s2 + $0x80] ss:$16 sps:$4 sm:$0xff]  }
   0x6   :  { %v2671_v16 = vld [vmem:[%s4142_s2 + $0x88] ss:$16 sps:$4 sm:$0xff]   ;;  %v2672_v17 = vld [vmem:[%s4142_s2 + $0x64] ss:$16 sps:$4 sm:$0xff]   ;;  %v2674_v18 = vld [vmem:[%s4142_s2 + $0x6c] ss:$16 sps:$4 sm:$0xff]  }
   0x7   :  { %276 = vmatpush1.bf16.msra.mxu0 %v2658_v7  ;;  %349 = vmatpush1.bf16.msra.mxu1 %v2659_v8  ;;  %v2676_v19 = vld [vmem:[%s4142_s2 + $0x60] ss:$16 sps:$4 sm:$0xff]   ;;  %v2677_v20 = vld [vmem:[%s4142_s2 + $0x68] ss:$16 sps:$4 sm:$0xff]   ;;  %v2678_v21 = vld [vmem:[%s4142_s2 + $0x44] ss:$16 sps:$4 sm:$0xff]  }
   0x8   :  { %277 = vmatprep.subr.bf16.mxu0 %v2660_v9  ;;  %350 = vmatprep.subr.bf16.mxu1 %v2662_v10  ;;  %v2680_v22 = vld [vmem:[%s4142_s2 + $0x4c] ss:$16 sps:$4 sm:$0xff]   ;;  %v2682_v23 = vld [vmem:[%s4142_s2 + $0x40] ss:$16 sps:$4 sm:$0xff]   ;;  %v2683_v24 = vld [vmem:[%s4142_s2 + $0x48] ss:$16 sps:$4 sm:$0xff]  }
   0x9   :  { %v2684_v25 = vld [vmem:[%s4142_s2 + $0x24] ss:$16 sps:$4 sm:$0xff]   ;;  %v2686_v26 = vld [vmem:[%s4142_s2 + $0x2c] ss:$16 sps:$4 sm:$0xff]   ;;  %v2688_v27 = vld [vmem:[%s4142_s2 + $0x20] ss:$16 sps:$4 sm:$0xff]  }
   0xa   :  { %v2689_v28 = vld [vmem:[%s4142_s2 + $0x28] ss:$16 sps:$4 sm:$0xff]   ;;  %v2690_v29 = vld [vmem:[%s4142_s2 + $0x4] ss:$16 sps:$4 sm:$0xff]   ;;  %v2692_v30 = vld [vmem:[%s4142_s2 + $0xc] ss:$16 sps:$4 sm:$0xff]  }
   0xb   :  { %278 = vmatpush1.bf16.msra.mxu0 %v2664_v11  ;;  %351 = vmatpush1.bf16.msra.mxu1 %v2665_v12  ;;  %v2694_v31 = vld [vmem:[%s4142_s2] ss:$16 sps:$4 sm:$0xff]   ;;  %v2695_v32 = vld [vmem:[%s4142_s2 + $0x8] ss:$16 sps:$4 sm:$0xff]   ;;  %v3096_v33 = vld [vmem:[%s4144_s3 + $0xe4] ss:$16 sps:$4 sm:$0xff]  }
   0xc   :  { %279 = vmatprep.subr.bf16.mxu0 %v2666_v13  ;;  %352 = vmatprep.subr.bf16.mxu1 %v2668_v14  ;;  %4168 = vst [vmem:[#allocation3_spill] sm:$0xff] %v3096_v33  ;;  %v3101_v34 = vld [vmem:[%s4144_s3 + $0xec] ss:$16 sps:$4 sm:$0xff]   ;;  %v2696_v35 = vld [vmem:[%s4143_s0] sm:$0xff]   ;;  %v3114_v37 = vld [vmem:[%s4144_s3 + $0xe8] ss:$16 sps:$4 sm:$0xff]  }
   0xd   :  { %4169 = vst [vmem:[#allocation4_spill] sm:$0xff] %v3101_v34  ;;  %v3109_v36 = vld [vmem:[%s4144_s3 + $0xe0] ss:$16 sps:$4 sm:$0xff]   ;;  %v3121_v38 = vld [vmem:[%s4144_s3 + $0xc4] ss:$16 sps:$4 sm:$0xff]   ;;  %v2708_v44 = vld [vmem:[%s4143_s0 + $0x8] sm:$0xff]  }
   0xe   :  { %v3126_v39 = vld [vmem:[%s4144_s3 + $0xcc] ss:$16 sps:$4 sm:$0xff]   ;;  %v3131_v40 = vld [vmem:[%s4144_s3 + $0xc0] ss:$16 sps:$4 sm:$0xff]   ;;  %v3136_v41 = vld [vmem:[%s4144_s3 + $0xa4] ss:$16 sps:$4 sm:$0xff]  }
   0xf   :  { %280 = vmatpush1.bf16.msra.mxu0 %v2670_v15  ;;  %353 = vmatpush1.bf16.msra.mxu1 %v2671_v16  ;;  %v3143_v42 = vld [vmem:[%s4144_s3 + $0xc8] ss:$16 sps:$4 sm:$0xff]   ;;  %v3150_v43 = vld [vmem:[%s4144_s3 + $0xac] ss:$16 sps:$4 sm:$0xff]   ;;  %v3160_v45 = vld [vmem:[%s4144_s3 + $0xa0] ss:$16 sps:$4 sm:$0xff]  }
  0x10   :  { %281 = vmatprep.subr.bf16.mxu0 %v2672_v17  ;;  %354 = vmatprep.subr.bf16.mxu1 %v2674_v18  ;;  %v3167_v46 = vld [vmem:[%s4144_s3 + $0xa8] ss:$16 sps:$4 sm:$0xff]   ;;  %v3174_v47 = vld [vmem:[%s4144_s3 + $0x84] ss:$16 sps:$4 sm:$0xff]   ;;  %v3179_v48 = vld [vmem:[%s4144_s3 + $0x8c] ss:$16 sps:$4 sm:$0xff]  }
  0x11   :  { %v3184_v49 = vld [vmem:[%s4144_s3 + $0x80] ss:$16 sps:$4 sm:$0xff]   ;;  %v3191_v50 = vld [vmem:[%s4144_s3 + $0x64] ss:$16 sps:$4 sm:$0xff]   ;;  %v3196_v51 = vld [vmem:[%s4144_s3 + $0x88] ss:$16 sps:$4 sm:$0xff]  }
  0x12   :  { %v3203_v52 = vld [vmem:[%s4144_s3 + $0x6c] ss:$16 sps:$4 sm:$0xff]   ;;  %v2721_v53 = vld [vmem:[%s4143_s0 + $0x10] sm:$0xff]   ;;  %v3220_v55 = vld [vmem:[%s4144_s3 + $0x68] ss:$16 sps:$4 sm:$0xff]   ;;  %v3343_v7 = vshrl.u32 %v69_v6, 7 }
  0x13   :  { %282 = vmatpush1.bf16.msra.mxu0 %v2676_v19  ;;  %355 = vmatpush1.bf16.msra.mxu1 %v2677_v20  ;;  %v3215_v54 = vld [vmem:[%s4144_s3 + $0x60] ss:$16 sps:$4 sm:$0xff]   ;;  %v3227_v56 = vld [vmem:[%s4144_s3 + $0x44] ss:$16 sps:$4 sm:$0xff]   ;;  %v3232_v57 = vld [vmem:[%s4144_s3 + $0x4c] ss:$16 sps:$4 sm:$0xff]  }
  0x14   :  { %283 = vmatprep.subr.bf16.mxu0 %v2678_v21  ;;  %356 = vmatprep.subr.bf16.mxu1 %v2680_v22  ;;  %v3239_v58 = vld [vmem:[%s4144_s3 + $0x40] ss:$16 sps:$4 sm:$0xff]   ;;  %v3244_v59 = vld [vmem:[%s4144_s3 + $0x48] ss:$16 sps:$4 sm:$0xff]   ;;  %v3251_v60 = vld [vmem:[%s4144_s3 + $0x24] ss:$16 sps:$4 sm:$0xff]  }
  0x15   :  { %v3256_v61 = vld [vmem:[%s4144_s3 + $0x2c] ss:$16 sps:$4 sm:$0xff]   ;;  %v3268_v63 = vld [vmem:[%s4144_s3 + $0x20] ss:$16 sps:$4 sm:$0xff]   ;;  %v3273_v0 = vld [vmem:[%s4144_s3 + $0x28] ss:$16 sps:$4 sm:$0xff]  }
  0x16   :  { %v2734_v62 = vld [vmem:[%s4143_s0 + $0x18] sm:$0xff]   ;;  %v3280_v2 = vld [vmem:[%s4144_s3 + $0x4] ss:$16 sps:$4 sm:$0xff]   ;;  %v3292_v4 = vld [vmem:[%s4144_s3] ss:$16 sps:$4 sm:$0xff]   ;;  %4170 = vst [vmem:[#allocation5_spill] sm:$0xff] %v3343_v7 }
  0x17   :  { %284 = vmatpush1.bf16.msra.mxu0 %v2682_v23  ;;  %357 = vmatpush1.bf16.msra.mxu1 %v2683_v24  ;;  %v3285_v3 = vld [vmem:[%s4144_s3 + $0xc] ss:$16 sps:$4 sm:$0xff]   ;;  %v3297_v5 = vld [vmem:[%s4144_s3 + $0x8] ss:$16 sps:$4 sm:$0xff]   ;;  %v4151_v8 = vsub.s32 2, %v3343_v7  ;;  %v4153_v9 = vsub.s32 0, %v3343_v7 }
  0x18   :  { %285 = vmatprep.subr.bf16.mxu0 %v2684_v25  ;;  %358 = vmatprep.subr.bf16.mxu1 %v2686_v26  ;;  %v4150_v10 = vsub.s32 3, %v3343_v7  ;;  %v67_v11 = vld [vmem:[%s4145_s4] sm:$0xf]  ;;  %v4152_v15 = vsub.s32 1, %v3343_v7  ;;  %v3372_v22 = vand.u32 127, %v69_v6  ;;  %vm1842_vm9 = vcmask 1043459  }
  0x19   :  { %v3357_v14 = vrot.slane %v67_v11, %v4151_v8  ;;  %v3366_v18 = vrot.slane %v67_v11, %v4153_v9  ;;  %vm1844_vm10 = vcmask 1044484   ;;  %vm1846_vm11 = vcmask 1045509  }
  0x1a   :  { %v3370_v19 = vrot.slane %v67_v11, %v4150_v10  ;;  %4171 = vst [vmem:[#allocation6_spill] sm:$0xff] %v3372_v22  ;;  %v3376_v23 = vrot.slane %v67_v11, %v4152_v15  ;;  %vm540_vm0 = vcmp.lt.s32.totalorder %v3372_v22, 64  ;;  %vm1848_vm12 = vcmask 1046534  }
  0x1b   :  { %286 = vmatpush1.bf16.msra.mxu0 %v2688_v27  ;;  %359 = vmatpush1.bf16.msra.mxu1 %v2689_v28  ;;  %vm1850_vm13 = vcmask 1047559   ;;  %vm2954_vm14 = vmmov 0  }
  0x1c   :  { %287 = vmatprep.subr.bf16.mxu0 %v2690_v29  ;;  %360 = vmatprep.subr.bf16.mxu1 %v2692_v30 }
  0x1f   :  { %288 = vmatpush1.bf16.msra.mxu0 %v2694_v31  ;;  %361 = vmatpush1.bf16.msra.mxu1 %v2695_v32  ;;  %v533_v32 = vadd.s32 128, %v3372_v22 }
  0x20   :  { %792 = vmatprep.subr.bf16.mxu0 %v3096_v33  ;;  %833 = vmatprep.subr.bf16.mxu1 %v3101_v34 }
  0x21   :  { %v537_v15 = vand.u32 127, %v533_v32 }
  0x22   :  { %306 = vmatmul.mubr.bf16.vlgmr.msra.gmra.mxu0 %v2696_v35  ;;  %379 = vmatmul.mubr.bf16.vlgmr.msra.gmra.mxu1 %v2696_v35  ;;  %v534_v35 = vadd.s32 256, %v3372_v22 }
  0x23   :  { %793 = vmatpush1.bf16.msra.mxu0 %v3109_v36  ;;  %834 = vmatpush1.bf16.msra.mxu1 %v3114_v37  ;;  %vm541_vm1 = vcmp.lt.s32.totalorder %v537_v15, 64 }
  0x24   :  { %794 = vmatprep.subr.bf16.mxu0 %v3121_v38  ;;  %315 = vmatprep.mubr.bf16.mxu0 %v4154_v1  ;;  %v538_v9 = vand.u32 127, %v534_v35  ;;  %vm3406_vm4 = vmpackc.low %vm541_vm1, %vm540_vm0 }
  0x25   :  { %388 = vmatprep.mubr.bf16.mxu1 %v4154_v1  ;;  %835 = vmatprep.subr.bf16.mxu1 %v3126_v39 }
  0x26   :  { %vm542_vm2 = vcmp.lt.s32.totalorder %v538_v9, 64 }
  0x27   :  { %795 = vmatpush1.bf16.msra.mxu0 %v3131_v40  ;;  %836 = vmatpush1.bf16.msra.mxu1 %v3143_v42 }
  0x28   :  { %796 = vmatprep.subr.bf16.mxu0 %v3136_v41  ;;  %837 = vmatprep.subr.bf16.mxu1 %v3150_v43 }
  0x2a   :  { %316 = vmatmul.mubr.bf16.gmra.mxu0 %v2708_v44  ;;  %389 = vmatmul.mubr.bf16.gmra.mxu1 %v2708_v44  ;;  %v535_v44 = vadd.s32 384, %v3372_v22 }
  0x2b   :  { %797 = vmatpush1.bf16.msra.mxu0 %v3160_v45  ;;  %838 = vmatpush1.bf16.msra.mxu1 %v3167_v46 }
  0x2c   :  { %798 = vmatprep.subr.bf16.mxu0 %v3174_v47  ;;  %325 = vmatprep.mubr.bf16.mxu0 %v4154_v1 }
  0x2d   :  { %398 = vmatprep.mubr.bf16.mxu1 %v4154_v1  ;;  %839 = vmatprep.subr.bf16.mxu1 %v3179_v48 }
  0x2f   :  { %799 = vmatpush1.bf16.msra.mxu0 %v3184_v49  ;;  %840 = vmatpush1.bf16.msra.mxu1 %v3196_v51 }
  0x30   :  { %800 = vmatprep.subr.bf16.mxu0 %v3191_v50  ;;  %841 = vmatprep.subr.bf16.mxu1 %v3203_v52 }
  0x32   :  { %326 = vmatmul.mubr.bf16.gmra.mxu0 %v2721_v53  ;;  %399 = vmatmul.mubr.bf16.gmra.mxu1 %v2721_v53 }
  0x33   :  { %801 = vmatpush1.bf16.msra.mxu0 %v3215_v54  ;;  %842 = vmatpush1.bf16.msra.mxu1 %v3220_v55 }
  0x34   :  { %802 = vmatprep.subr.bf16.mxu0 %v3227_v56  ;;  %335 = vmatprep.mubr.bf16.mxu0 %v4154_v1 }
  0x35   :  { %408 = vmatprep.mubr.bf16.mxu1 %v4154_v1  ;;  %843 = vmatprep.subr.bf16.mxu1 %v3232_v57 }
  0x37   :  { %803 = vmatpush1.bf16.msra.mxu0 %v3239_v58  ;;  %844 = vmatpush1.bf16.msra.mxu1 %v3244_v59 }
  0x38   :  { %804 = vmatprep.subr.bf16.mxu0 %v3251_v60  ;;  %845 = vmatprep.subr.bf16.mxu1 %v3256_v61 }
  0x3a   :  { %336 = vmatmul.mubr.bf16.gmra.mxu0 %v2734_v62  ;;  %409 = vmatmul.mubr.bf16.gmra.mxu1 %v2734_v62 }
  0x3b   :  { %805 = vmatpush1.bf16.msra.mxu0 %v3268_v63  ;;  %846 = vmatpush1.bf16.msra.mxu1 %v3273_v0 }
  0x3c   :  { %806 = vmatprep.subr.bf16.mxu0 %v3280_v2  ;;  %824 = vmatprep.mubr.bf16.mxu0 %v4154_v1 }
  0x3d   :  { %847 = vmatprep.subr.bf16.mxu1 %v3285_v3  ;;  %865 = vmatprep.mubr.bf16.mxu1 %v4154_v1 }
  0x3f   :  { %807 = vmatpush1.bf16.msra.mxu0 %v3292_v4  ;;  %848 = vmatpush1.bf16.msra.mxu1 %v3297_v5 }
  0x40   :  { %910 = vmatprep.subr.bf16.mxu0 %v3096_v33  ;;  %951 = vmatprep.subr.bf16.mxu1 %v3101_v34 }
  0x42   :  { %825 = vmatmul.mubr.bf16.vlgmr.msra.gmra.mxu0 %v4154_v1  ;;  %866 = vmatmul.mubr.bf16.vlgmr.msra.gmra.mxu1 %v4154_v1 }
  0x43   :  { %911 = vmatpush1.bf16.msra.mxu0 %v3109_v36  ;;  %952 = vmatpush1.bf16.msra.mxu1 %v3114_v37 }
  0x44   :  { %912 = vmatprep.subr.bf16.mxu0 %v3121_v38  ;;  %953 = vmatprep.subr.bf16.mxu1 %v3126_v39 }
  0x45   :  { %942 = vmatprep.mubr.bf16.mxu0 %v4154_v1  ;;  %983 = vmatprep.mubr.bf16.mxu1 %v4154_v1  ;;  %v539_v1 = vand.u32 127, %v535_v44 }
  0x47   :  { %913 = vmatpush1.bf16.msra.mxu0 %v3131_v40  ;;  %954 = vmatpush1.bf16.msra.mxu1 %v3143_v42  ;;  %vm543_vm3 = vcmp.lt.s32.totalorder %v539_v1, 64 }
  0x48   :  { %914 = vmatprep.subr.bf16.mxu0 %v3136_v41  ;;  %955 = vmatprep.subr.bf16.mxu1 %v3150_v43  ;;  %vm3410_vm5 = vmpackc.low %vm543_vm3, %vm542_vm2 }
  0x4b   :  { %915 = vmatpush1.bf16.msra.mxu0 %v3160_v45  ;;  %956 = vmatpush1.bf16.msra.mxu1 %v3167_v46 }
  0x4c   :  { %916 = vmatprep.subr.bf16.mxu0 %v3174_v47  ;;  %957 = vmatprep.subr.bf16.mxu1 %v3179_v48 }
  0x4f   :  { %917 = vmatpush1.bf16.msra.mxu0 %v3184_v49  ;;  %958 = vmatpush1.bf16.msra.mxu1 %v3196_v51 }
  0x50   :  { %918 = vmatprep.subr.bf16.mxu0 %v3191_v50  ;;  %959 = vmatprep.subr.bf16.mxu1 %v3203_v52 }
  0x53   :  { %919 = vmatpush1.bf16.msra.mxu0 %v3215_v54  ;;  %960 = vmatpush1.bf16.msra.mxu1 %v3220_v55 }
  0x54   :  { %920 = vmatprep.subr.bf16.mxu0 %v3227_v56  ;;  %961 = vmatprep.subr.bf16.mxu1 %v3232_v57 }
  0x57   :  { %921 = vmatpush1.bf16.msra.mxu0 %v3239_v58  ;;  %962 = vmatpush1.bf16.msra.mxu1 %v3244_v59 }
  0x58   :  { %922 = vmatprep.subr.bf16.mxu0 %v3251_v60  ;;  %963 = vmatprep.subr.bf16.mxu1 %v3256_v61 }
  0x5b   :  { %923 = vmatpush1.bf16.msra.mxu0 %v3268_v63  ;;  %964 = vmatpush1.bf16.msra.mxu1 %v3273_v0 }
  0x5c   :  { %924 = vmatprep.subr.bf16.mxu0 %v3280_v2  ;;  %965 = vmatprep.subr.bf16.mxu1 %v3285_v3 }
  0x5f   :  { %925 = vmatpush1.bf16.msra.mxu0 %v3292_v4  ;;  %966 = vmatpush1.bf16.msra.mxu1 %v3297_v5 }
  0x60   :  { %1028 = vmatprep.subr.bf16.mxu0 %v3096_v33  ;;  %1069 = vmatprep.subr.bf16.mxu1 %v3101_v34 }
  0xe2   :  { %v3351_v12 = vpop.f32.mrf.mxu0  ;;  %v3353_v13 = vpop.f32.mrf.mxu1 }
  0xe4   :  { %v3360_v16 = vpop.f32.mrf.mxu0  ;;  %v3362_v17 = vpop.f32.mrf.mxu1 }
  0xe6   :  { %v311_v20 = vpop.f32.mrf.mxu0  ;;  %v384_v21 = vpop.f32.mrf.mxu1 }
  0xe7   :  { %v312_v24 = vadd.f32 %v311_v20, %v3366_v18  ;;  %v385_v25 = vadd.f32 %v384_v21, %v3357_v14 }
  0xe8   :  { %v313_v26 = vpop.f32.mrf.mxu0  ;;  %v386_v27 = vpop.f32.mrf.mxu1 }
  0xe9   :  { %v314_v28 = vadd.f32 %v313_v26, %v3376_v23  ;;  %v387_v29 = vadd.f32 %v386_v27, %v3370_v19 }
  0xea   :  { %v317_v30 = vpop.f32.mrf.mxu0  ;;  %v390_v31 = vpop.f32.mrf.mxu1 }
  0xeb   :  { %v3385_v53 = vpack.c.bf16 %v314_v28, %v312_v24  ;;  %v3387_v62 = vpack.c.bf16 %v387_v29, %v385_v25  ;;  %v318_v6 = vadd.f32 %v317_v30, %v3366_v18  ;;  %v391_v11 = vadd.f32 %v390_v31, %v3357_v14 }
  0xec   :  { %v319_v20 = vpop.f32.mrf.mxu0  ;;  %v392_v21 = vpop.f32.mrf.mxu1 }
  0xed   :  { %v320_v26 = vadd.f32 %v319_v20, %v3376_v23  ;;  %v393_v27 = vadd.f32 %v392_v21, %v3370_v19 }
  0xee   :  { %v321_v10 = vpop.f32.mrf.mxu0  ;;  %v394_v8 = vpop.f32.mrf.mxu1 }
  0xef   :  { %v3393_v7 = vpack.c.bf16 %v320_v26, %v318_v6  ;;  %v3395_v24 = vpack.c.bf16 %v393_v27, %v391_v11  ;;  %v322_v25 = vadd.f32 %v321_v10, %v3366_v18  ;;  %v395_v28 = vadd.f32 %v394_v8, %v3357_v14 }
  0xf0   :  { %v323_v29 = vpop.f32.mrf.mxu0  ;;  %v396_v30 = vpop.f32.mrf.mxu1 }
  0xf1   :  { %v324_v31 = vadd.f32 %v323_v29, %v3376_v23  ;;  %v397_v20 = vadd.f32 %v396_v30, %v3370_v19 }
  0xf2   :  { %v327_v21 = vpop.f32.mrf.mxu0  ;;  %v400_v34 = vpop.f32.mrf.mxu1 }
  0xf3   :  { %v2526_v32 = vpack.c.bf16 %v324_v31, %v322_v25  ;;  %v2527_v35 = vpack.c.bf16 %v397_v20, %v395_v28  ;;  %v328_v44 = vadd.f32 %v327_v21, %v3366_v18  ;;  %v401_v10 = vadd.f32 %v400_v34, %v3357_v14 }
  0xf4   :  { %v329_v8 = vpop.f32.mrf.mxu0  ;;  %v402_v6 = vpop.f32.mrf.mxu1 }
  0xf5   :  { %v330_v11 = vadd.f32 %v329_v8, %v3376_v23  ;;  %v403_v26 = vadd.f32 %v402_v6, %v3370_v19 }
  0xf6   :  { %v331_v29 = vpop.f32.mrf.mxu0  ;;  %v404_v15 = vpop.f32.mrf.mxu1 }
  0xf7   :  { %v2528_v9 = vpack.c.bf16 %v330_v11, %v328_v44  ;;  %v2529_v25 = vpack.c.bf16 %v403_v26, %v401_v10  ;;  %v332_v34 = vadd.f32 %v331_v29, %v3366_v18  ;;  %v405_v28 = vadd.f32 %v404_v15, %v3357_v14 }
  0xf8   :  { %v333_v30 = vpop.f32.mrf.mxu0  ;;  %v406_v31 = vpop.f32.mrf.mxu1 }
  0xf9   :  { %v334_v20 = vadd.f32 %v333_v30, %v3376_v23  ;;  %v407_v21 = vadd.f32 %v406_v31, %v3370_v19  ;;  %v3420_v8 = vsel %vm3406_vm4, %v2526_v32, %v2528_v9  ;;  %v3424_v6 = vsel %vm3410_vm5, %v2527_v35, %v2529_v25 }
  0xfa   :  { %4176 = vst [vmem:[#allocation7_spill] sm:$0xff] %v3420_v8  ;;  %4177 = vst [vmem:[#allocation8_spill] sm:$0xff] %v3424_v6  ;;  %v337_v44 = vpop.f32.mrf.mxu0  ;;  %v410_v10 = vpop.f32.mrf.mxu1  ;;  %v3430_v31 = vsel %vm3406_vm4, %v2528_v9, %v2526_v32  ;;  %v3434_v8 = vsel %vm3410_vm5, %v2529_v25, %v2527_v35  ;;  %v310_v35 = vadd.f32 %v3360_v16, %v3376_v23 }
  0xfb   :  { %v2530_v11 = vpack.c.bf16 %v334_v20, %v332_v34  ;;  %v2531_v26 = vpack.c.bf16 %v407_v21, %v405_v28  ;;  %v338_v29 = vadd.f32 %v337_v44, %v3366_v18  ;;  %v411_v15 = vadd.f32 %v410_v10, %v3357_v14  ;;  %4178 = vst [vmem:[#allocation9_spill] sm:$0xff] %v3430_v31 }
  0xfc   :  { %v339_v22 = vpop.f32.mrf.mxu0  ;;  %v412_v30 = vpop.f32.mrf.mxu1  ;;  %4179 = vst [vmem:[#allocation10_spill] sm:$0xff] %v3434_v8  ;;  %v383_v16 = vadd.f32 %v3362_v17, %v3370_v19 }
  0xfd   :  { %v340_v6 = vadd.f32 %v339_v22, %v3376_v23  ;;  %v413_v33 = vadd.f32 %v412_v30, %v3370_v19  ;;  %v3441_v34 = vsel %vm3406_vm4, %v3393_v7, %v2530_v11  ;;  %v3446_v28 = vsel %vm3410_vm5, %v3395_v24, %v2531_v26 }
  0xfe   :  { %4180 = vst [vmem:[#allocation11_spill] sm:$0xff] %v3446_v28  ;;  %v341_v32 = vpop.f32.mrf.mxu0  ;;  %v414_v9 = vpop.f32.mrf.mxu1  ;;  %v308_v22 = vadd.f32 %v3351_v12, %v3366_v18  ;;  %v381_v12 = vadd.f32 %v3353_v13, %v3357_v14 }
  0xff   :  { %v2532_v25 = vpack.c.bf16 %v340_v6, %v338_v29  ;;  %v2533_v20 = vpack.c.bf16 %v413_v33, %v411_v15  ;;  %v342_v21 = vadd.f32 %v341_v32, %v3366_v18  ;;  %v415_v44 = vadd.f32 %v414_v9, %v3357_v14 }
 0x100   :  { %v343_v10 = vpop.f32.mrf.mxu0  ;;  %v416_v30 = vpop.f32.mrf.mxu1  ;;  %v2520_v6 = vpack.c.bf16 %v310_v35, %v308_v22  ;;  %v3473_v15 = vsel %vm3406_vm4, %v2530_v11, %v3393_v7  ;;  %v3478_v32 = vsel %vm3410_vm5, %v2531_v26, %v3395_v24  ;;  %v2521_v26 = vpack.c.bf16 %v383_v16, %v381_v12 }
 0x101   :  { %v344_v8 = vadd.f32 %v343_v10, %v3376_v23  ;;  %v417_v31 = vadd.f32 %v416_v30, %v3370_v19  ;;  %v3459_v28 = vsel %vm3406_vm4, %v3385_v53, %v2532_v25  ;;  %v3464_v33 = vsel %vm3410_vm5, %v3387_v62, %v2533_v20 }
 0x102   :  { %v826_v18 = vpop.f32.mrf.mxu0  ;;  %v867_v23 = vpop.f32.mrf.mxu1  ;;  %v3485_v17 = vsel %vm3406_vm4, %v2532_v25, %v3385_v53  ;;  %v3490_v7 = vsel %vm3410_vm5, %v2533_v20, %v3387_v62 }
 0x103   :  { %v2534_v29 = vpack.c.bf16 %v344_v8, %v342_v21  ;;  %v2535_v13 = vpack.c.bf16 %v417_v31, %v415_v44 }
 0x104   :  { %v828_v9 = vpop.f32.mrf.mxu0  ;;  %v869_v10 = vpop.f32.mrf.mxu1 }
 0x105   :  { %v550_v14 = vsel %vm3406_vm4, %v2520_v6, %v2534_v29  ;;  %v3494_v44 = vsel %vm3406_vm4, %v2534_v29, %v2520_v6  ;;  %v3498_v53 = vsel %vm3410_vm5, %v2535_v13, %v2521_v26  ;;  %v551_v20 = vsel %vm3410_vm5, %v2521_v26, %v2535_v13 }
 0x106   :  { %v596_v19 = vunpack.c.l.bf16 %v550_v14  ;;  %v597_v8 = vunpack.c.h.bf16 %v550_v14  ;;  %v830_v24 = vpop.f32.mrf.mxu0  ;;  %v871_v11 = vpop.f32.mrf.mxu1  ;;  %v598_v30 = vunpack.c.l.bf16 %v551_v20  ;;  %v599_v16 = vunpack.c.h.bf16 %v551_v20 }
 0x107   :  { %v905_v20 = vunpack.c.l.bf16 %v3459_v28 }
 0x108   :  { %v874_v35 = vadd.f32 %v826_v18, %v596_v19  ;;  %v875_v31 = vadd.f32 %v828_v9, %v597_v8  ;;  %v831_v22 = vpop.f32.mrf.mxu0  ;;  %v872_v21 = vpop.f32.mrf.mxu1  ;;  %v876_v12 = vadd.f32 %v867_v23, %v598_v30  ;;  %v877_v9 = vadd.f32 %v869_v10, %v599_v16 }
 0x109   :  { %v4181_v21 = vmov 0  }
 0x10a   :  { %v2456_v25 = vmul.f32 -1.442695, %v874_v35  ;;  %v2457_v62 = vmul.f32 -1.442695, %v875_v31  ;;  %v2458_v18 = vmul.f32 -1.442695, %v876_v12 }
 0x10c   :  { %2788 = vpow2.f32 %v2456_v25  ;;  %v4182_v25 = vld [vmem:[#allocation3_spill] sm:$0xff] }
 0x10d   :  { %2790 = vpow2.f32 %v2457_v62  ;;  %v4183_v62 = vld [vmem:[#allocation4_spill] sm:$0xff] }
 0x10e   :  { %2792 = vpow2.f32 %v2458_v18  ;;  %v906_v18 = vunpack.c.h.bf16 %v3459_v28 }
 0x10f   :  { %2794 = vtanh.f32 %v877_v9 }
 0x119   :  { %v2789_v14 = vpop.eup %2788 }
 0x11a   :  { %v2791_v27 = vpop.eup %2790  ;;  %v887_v6 = vadd.f32 1.0, %v2789_v14 }
 0x11b   :  { %v888_v29 = vadd.f32 1.0, %v2791_v27  ;;  %v2793_v19 = vpop.eup %2792 }
 0x11c   :  { %2796 = vrcp.f32 %v887_v6  ;;  %v2795_v8 = vpop.eup %2794  ;;  %v889_v13 = vadd.f32 1.0, %v2793_v19 }
 0x11d   :  { %2798 = vrcp.f32 %v888_v29 }
 0x11e   :  { %2800 = vrcp.f32 %v889_v13  ;;  %v907_v13 = vunpack.c.l.bf16 %v3464_v33 }
 0x129   :  { %v2797_v24 = vpop.eup %2796 }
 0x12a   :  { %v2799_v1 = vpop.eup %2798  ;;  %v898_v11 = vmul.f32 %v2797_v24, %v2795_v8 }
 0x12b   :  { %v897_v26 = vmul.f32 0.0, %v2799_v1  ;;  %v2801_v23 = vpop.eup %2800 }
 0x12d   :  { %v3502_v35 = vadd.f32 %v898_v11, %v897_v26  ;;  %v908_v26 = vunpack.c.h.bf16 %v3464_v33 }
 0x12f   :  { %2802 = vtanh.f32 %v3502_v35 }
 0x13c   :  { %v2803_v10 = vpop.eup %2802 }
 0x13d   :  { %v3505_v31 = vmul.f32 %v2803_v10, %v2801_v23 }
 0x13f   :  { %v909_v22 = vpack.c.bf16 %v3505_v31, %v3505_v31 }
 0x141   :  { %943 = vmatmul.mubr.bf16.vlgmr.msra.gmra.mxu0 %v909_v22  ;;  %984 = vmatmul.mubr.bf16.vlgmr.msra.gmra.mxu1 %v909_v22 }
 0x142   :  { %1029 = vmatpush1.bf16.msra.mxu0 %v3109_v36  ;;  %1070 = vmatpush1.bf16.msra.mxu1 %v3114_v37 }
 0x143   :  { %1030 = vmatprep.subr.bf16.mxu0 %v3121_v38  ;;  %1071 = vmatprep.subr.bf16.mxu1 %v3126_v39 }
 0x144   :  { %1060 = vmatprep.mubr.bf16.mxu0 %v4181_v21  ;;  %1101 = vmatprep.mubr.bf16.mxu1 %v4181_v21 }
 0x146   :  { %1031 = vmatpush1.bf16.msra.mxu0 %v3131_v40  ;;  %1072 = vmatpush1.bf16.msra.mxu1 %v3143_v42 }
 0x147   :  { %1032 = vmatprep.subr.bf16.mxu0 %v3136_v41  ;;  %1073 = vmatprep.subr.bf16.mxu1 %v3150_v43 }
 0x14a   :  { %1033 = vmatpush1.bf16.msra.mxu0 %v3160_v45  ;;  %1074 = vmatpush1.bf16.msra.mxu1 %v3167_v46 }
 0x14b   :  { %1034 = vmatprep.subr.bf16.mxu0 %v3174_v47  ;;  %1075 = vmatprep.subr.bf16.mxu1 %v3179_v48 }
 0x14e   :  { %1035 = vmatpush1.bf16.msra.mxu0 %v3184_v49  ;;  %1076 = vmatpush1.bf16.msra.mxu1 %v3196_v51 }
 0x14f   :  { %1036 = vmatprep.subr.bf16.mxu0 %v3191_v50  ;;  %1077 = vmatprep.subr.bf16.mxu1 %v3203_v52 }
 0x152   :  { %1037 = vmatpush1.bf16.msra.mxu0 %v3215_v54  ;;  %1078 = vmatpush1.bf16.msra.mxu1 %v3220_v55 }
 0x153   :  { %1038 = vmatprep.subr.bf16.mxu0 %v3227_v56  ;;  %1079 = vmatprep.subr.bf16.mxu1 %v3232_v57 }
 0x156   :  { %1039 = vmatpush1.bf16.msra.mxu0 %v3239_v58  ;;  %1080 = vmatpush1.bf16.msra.mxu1 %v3244_v59 }
 0x157   :  { %1040 = vmatprep.subr.bf16.mxu0 %v3251_v60  ;;  %1081 = vmatprep.subr.bf16.mxu1 %v3256_v61 }
 0x15a   :  { %1041 = vmatpush1.bf16.msra.mxu0 %v3268_v63  ;;  %1082 = vmatpush1.bf16.msra.mxu1 %v3273_v0 }
 0x15b   :  { %1042 = vmatprep.subr.bf16.mxu0 %v3280_v2  ;;  %1083 = vmatprep.subr.bf16.mxu1 %v3285_v3 }
 0x15e   :  { %1043 = vmatpush1.bf16.msra.mxu0 %v3292_v4  ;;  %1084 = vmatpush1.bf16.msra.mxu1 %v3297_v5 }
 0x15f   :  { %1146 = vmatprep.subr.bf16.mxu0 %v4182_v25  ;;  %1187 = vmatprep.subr.bf16.mxu1 %v4183_v62 }
 0x201   :  { %v944_v30 = vpop.f32.mrf.mxu0  ;;  %v985_v12 = vpop.f32.mrf.mxu1 }
 0x202   :  { %v992_v16 = vadd.f32 %v944_v30, %v905_v20  ;;  %v994_v11 = vadd.f32 %v985_v12, %v907_v13 }
 0x203   :  { %v946_v9 = vpop.f32.mrf.mxu0  ;;  %v987_v14 = vpop.f32.mrf.mxu1 }
 0x204   :  { %v2459_v27 = vmul.f32 -1.442695, %v992_v16  ;;  %v993_v6 = vadd.f32 %v946_v9, %v906_v18  ;;  %v2461_v23 = vmul.f32 -1.442695, %v994_v11  ;;  %v995_v10 = vadd.f32 %v987_v14, %v908_v26 }
 0x205   :  { %v948_v29 = vpop.f32.mrf.mxu0  ;;  %v989_v19 = vpop.f32.mrf.mxu1  ;;  %v1024_v26 = vunpack.c.h.bf16 %v3441_v34 }
 0x206   :  { %2804 = vpow2.f32 %v2459_v27  ;;  %v2460_v8 = vmul.f32 -1.442695, %v993_v6 }
 0x207   :  { %v949_v24 = vpop.f32.mrf.mxu0  ;;  %v990_v1 = vpop.f32.mrf.mxu1 }
 0x208   :  { %2806 = vpow2.f32 %v2460_v8 }
 0x209   :  { %2808 = vpow2.f32 %v2461_v23 }
 0x20a   :  { %2810 = vtanh.f32 %v995_v10 }
 0x213   :  { %v2805_v22 = vpop.eup %2804 }
 0x214   :  { %v1005_v28 = vadd.f32 1.0, %v2805_v22 }
 0x215   :  { %v2807_v20 = vpop.eup %2806 }
 0x216   :  { %2812 = vrcp.f32 %v1005_v28  ;;  %v1006_v30 = vadd.f32 1.0, %v2807_v20  ;;  %v2809_v16 = vpop.eup %2808 }
 0x217   :  { %v2811_v18 = vpop.eup %2810  ;;  %v1007_v29 = vadd.f32 1.0, %v2809_v16 }
 0x218   :  { %2814 = vrcp.f32 %v1006_v30 }
 0x219   :  { %2816 = vrcp.f32 %v1007_v29 }
 0x223   :  { %v2813_v9 = vpop.eup %2812 }
 0x224   :  { %v1016_v27 = vmul.f32 %v2813_v9, %v2811_v18 }
 0x225   :  { %v2815_v6 = vpop.eup %2814 }
 0x226   :  { %v1015_v12 = vmul.f32 %v2815_v6, %v3502_v35  ;;  %v2817_v33 = vpop.eup %2816  ;;  %v1023_v35 = vunpack.c.l.bf16 %v3441_v34 }
 0x228   :  { %v3548_v19 = vadd.f32 %v1016_v27, %v1015_v12  ;;  %v4184_v27 = vld [vmem:[#allocation11_spill] sm:$0xff] }
 0x229   :  { %v1025_v6 = vunpack.c.l.bf16 %v4184_v27  ;;  %v1026_v12 = vunpack.c.h.bf16 %v4184_v27 }
 0x22a   :  { %2818 = vtanh.f32 %v3548_v19 }
 0x237   :  { %v2819_v14 = vpop.eup %2818 }
 0x238   :  { %v3551_v8 = vmul.f32 %v2819_v14, %v2817_v33 }
 0x23a   :  { %v1027_v24 = vpack.c.bf16 %v3551_v8, %v3551_v8 }
 0x23c   :  { %1061 = vmatmul.mubr.bf16.vlgmr.msra.gmra.mxu0 %v1027_v24  ;;  %1102 = vmatmul.mubr.bf16.vlgmr.msra.gmra.mxu1 %v1027_v24 }
 0x23d   :  { %1147 = vmatpush1.bf16.msra.mxu0 %v3109_v36  ;;  %1188 = vmatpush1.bf16.msra.mxu1 %v3114_v37 }
 0x23e   :  { %1148 = vmatprep.subr.bf16.mxu0 %v3121_v38  ;;  %1189 = vmatprep.subr.bf16.mxu1 %v3126_v39 }
 0x23f   :  { %1178 = vmatprep.mubr.bf16.mxu0 %v4181_v21  ;;  %1219 = vmatprep.mubr.bf16.mxu1 %v4181_v21 }
 0x241   :  { %1149 = vmatpush1.bf16.msra.mxu0 %v3131_v40  ;;  %1190 = vmatpush1.bf16.msra.mxu1 %v3143_v42 }
 0x242   :  { %1150 = vmatprep.subr.bf16.mxu0 %v3136_v41  ;;  %1191 = vmatprep.subr.bf16.mxu1 %v3150_v43 }
 0x245   :  { %1151 = vmatpush1.bf16.msra.mxu0 %v3160_v45  ;;  %1192 = vmatpush1.bf16.msra.mxu1 %v3167_v46 }
 0x246   :  { %1152 = vmatprep.subr.bf16.mxu0 %v3174_v47  ;;  %1193 = vmatprep.subr.bf16.mxu1 %v3179_v48 }
 0x249   :  { %1153 = vmatpush1.bf16.msra.mxu0 %v3184_v49  ;;  %1194 = vmatpush1.bf16.msra.mxu1 %v3196_v51 }
 0x24a   :  { %1154 = vmatprep.subr.bf16.mxu0 %v3191_v50  ;;  %1195 = vmatprep.subr.bf16.mxu1 %v3203_v52 }
 0x24d   :  { %1155 = vmatpush1.bf16.msra.mxu0 %v3215_v54  ;;  %1196 = vmatpush1.bf16.msra.mxu1 %v3220_v55 }
 0x24e   :  { %1156 = vmatprep.subr.bf16.mxu0 %v3227_v56  ;;  %1197 = vmatprep.subr.bf16.mxu1 %v3232_v57 }
 0x251   :  { %1157 = vmatpush1.bf16.msra.mxu0 %v3239_v58  ;;  %1198 = vmatpush1.bf16.msra.mxu1 %v3244_v59 }
 0x252   :  { %1158 = vmatprep.subr.bf16.mxu0 %v3251_v60  ;;  %1199 = vmatprep.subr.bf16.mxu1 %v3256_v61 }
 0x255   :  { %1159 = vmatpush1.bf16.msra.mxu0 %v3268_v63  ;;  %1200 = vmatpush1.bf16.msra.mxu1 %v3273_v0 }
 0x256   :  { %1160 = vmatprep.subr.bf16.mxu0 %v3280_v2  ;;  %1201 = vmatprep.subr.bf16.mxu1 %v3285_v3 }
 0x259   :  { %1161 = vmatpush1.bf16.msra.mxu0 %v3292_v4  ;;  %1202 = vmatpush1.bf16.msra.mxu1 %v3297_v5 }
 0x25a   :  { %1264 = vmatprep.subr.bf16.mxu0 %v4182_v25  ;;  %1305 = vmatprep.subr.bf16.mxu1 %v4183_v62 }
 0x2fc   :  { %v1062_v1 = vpop.f32.mrf.mxu0  ;;  %v1103_v13 = vpop.f32.mrf.mxu1 }
 0x2fd   :  { %v1110_v11 = vadd.f32 %v1062_v1, %v1023_v35  ;;  %v1112_v29 = vadd.f32 %v1103_v13, %v1025_v6 }
 0x2fe   :  { %v1064_v23 = vpop.f32.mrf.mxu0  ;;  %v1105_v10 = vpop.f32.mrf.mxu1 }
 0x2ff   :  { %v2462_v22 = vmul.f32 -1.442695, %v1110_v11  ;;  %v1111_v28 = vadd.f32 %v1064_v23, %v1024_v26  ;;  %v2464_v33 = vmul.f32 -1.442695, %v1112_v29  ;;  %v1113_v14 = vadd.f32 %v1105_v10, %v1026_v12 }
 0x300   :  { %v1066_v20 = vpop.f32.mrf.mxu0  ;;  %v1107_v30 = vpop.f32.mrf.mxu1 }
 0x301   :  { %2820 = vpow2.f32 %v2462_v22  ;;  %v2463_v16 = vmul.f32 -1.442695, %v1111_v28 }
 0x302   :  { %v1067_v18 = vpop.f32.mrf.mxu0  ;;  %v1108_v9 = vpop.f32.mrf.mxu1 }
 0x303   :  { %2822 = vpow2.f32 %v2463_v16  ;;  %v1020_v18 = vadd.f32 %v3551_v8, %v3505_v31 }
 0x304   :  { %2824 = vpow2.f32 %v2464_v33 }
 0x305   :  { %2826 = vtanh.f32 %v1113_v14 }
 0x30e   :  { %v2821_v24 = vpop.eup %2820 }
 0x30f   :  { %v1123_v34 = vadd.f32 1.0, %v2821_v24 }
 0x310   :  { %v2823_v35 = vpop.eup %2822 }
 0x311   :  { %2828 = vrcp.f32 %v1123_v34  ;;  %v1124_v1 = vadd.f32 1.0, %v2823_v35  ;;  %v2825_v11 = vpop.eup %2824 }
 0x312   :  { %v2827_v26 = vpop.eup %2826  ;;  %v1125_v20 = vadd.f32 1.0, %v2825_v11 }
 0x313   :  { %2830 = vrcp.f32 %v1124_v1 }
 0x314   :  { %2832 = vrcp.f32 %v1125_v20 }
 0x31e   :  { %v2829_v23 = vpop.eup %2828 }
 0x31f   :  { %v1134_v22 = vmul.f32 %v2829_v23, %v2827_v26 }
 0x320   :  { %v2831_v28 = vpop.eup %2830 }
 0x321   :  { %v1133_v13 = vmul.f32 %v2831_v28, %v3548_v19  ;;  %v2833_v10 = vpop.eup %2832 }
 0x323   :  { %v3594_v30 = vadd.f32 %v1134_v22, %v1133_v13 }
 0x325   :  { %2834 = vtanh.f32 %v3594_v30 }
 0x332   :  { %v2835_v16 = vpop.eup %2834 }
 0x333   :  { %v1137_v9 = vmul.f32 %v2835_v16, %v2833_v10 }
 0x335   :  { %v3599_v27 = vadd.f32 %v1137_v9, %v1020_v18  ;;  %v1145_v6 = vpack.c.bf16 %v1137_v9, %v1137_v9 }
 0x337   :  { %1179 = vmatmul.mubr.bf16.vlgmr.msra.gmra.mxu0 %v1145_v6  ;;  %1220 = vmatmul.mubr.bf16.vlgmr.msra.gmra.mxu1 %v1145_v6  ;;  %v3649_v6 = vld [vmem:[%s4144_s3 + $0xe0] ss:$16 sps:$4 sm:$0xff]  }
 0x338   :  { %1265 = vmatpush1.bf16.msra.mxu0 %v3109_v36  ;;  %1306 = vmatpush1.bf16.msra.mxu1 %v3114_v37  ;;  %v4185_v36 = vld [vmem:[#allocation7_spill] sm:$0xff] }
 0x339   :  { %1266 = vmatprep.subr.bf16.mxu0 %v3121_v38  ;;  %1307 = vmatprep.subr.bf16.mxu1 %v3126_v39  ;;  %v1141_v37 = vunpack.c.l.bf16 %v4185_v36 }
 0x33a   :  { %1296 = vmatprep.mubr.bf16.mxu0 %v4181_v21  ;;  %1337 = vmatprep.mubr.bf16.mxu1 %v4181_v21 }
 0x33c   :  { %1267 = vmatpush1.bf16.msra.mxu0 %v3131_v40  ;;  %1308 = vmatpush1.bf16.msra.mxu1 %v3143_v42 }
 0x33d   :  { %1268 = vmatprep.subr.bf16.mxu0 %v3136_v41  ;;  %1309 = vmatprep.subr.bf16.mxu1 %v3150_v43  ;;  %v1142_v41 = vunpack.c.h.bf16 %v4185_v36  ;;  %v3667_v36 = vld [vmem:[%s4144_s3 + $0xcc] ss:$16 sps:$4 sm:$0xff]  }
 0x340   :  { %1269 = vmatpush1.bf16.msra.mxu0 %v3160_v45  ;;  %1310 = vmatpush1.bf16.msra.mxu1 %v3167_v46 }
 0x341   :  { %1270 = vmatprep.subr.bf16.mxu0 %v3174_v47  ;;  %1311 = vmatprep.subr.bf16.mxu1 %v3179_v48 }
 0x344   :  { %1271 = vmatpush1.bf16.msra.mxu0 %v3184_v49  ;;  %1312 = vmatpush1.bf16.msra.mxu1 %v3196_v51 }
 0x345   :  { %1272 = vmatprep.subr.bf16.mxu0 %v3191_v50  ;;  %1313 = vmatprep.subr.bf16.mxu1 %v3203_v52 }
 0x348   :  { %1273 = vmatpush1.bf16.msra.mxu0 %v3215_v54  ;;  %1314 = vmatpush1.bf16.msra.mxu1 %v3220_v55 }
 0x349   :  { %1274 = vmatprep.subr.bf16.mxu0 %v3227_v56  ;;  %1315 = vmatprep.subr.bf16.mxu1 %v3232_v57 }
 0x34c   :  { %1275 = vmatpush1.bf16.msra.mxu0 %v3239_v58  ;;  %1316 = vmatpush1.bf16.msra.mxu1 %v3244_v59 }
 0x34d   :  { %1276 = vmatprep.subr.bf16.mxu0 %v3251_v60  ;;  %1317 = vmatprep.subr.bf16.mxu1 %v3256_v61 }
 0x350   :  { %1277 = vmatpush1.bf16.msra.mxu0 %v3268_v63  ;;  %1318 = vmatpush1.bf16.msra.mxu1 %v3273_v0 }
 0x351   :  { %1278 = vmatprep.subr.bf16.mxu0 %v3280_v2  ;;  %1319 = vmatprep.subr.bf16.mxu1 %v3285_v3 }
 0x354   :  { %1279 = vmatpush1.bf16.msra.mxu0 %v3292_v4  ;;  %1320 = vmatpush1.bf16.msra.mxu1 %v3297_v5 }
 0x355   :  { %1382 = vmatprep.subr.bf16.mxu0 %v4182_v25  ;;  %1423 = vmatprep.subr.bf16.mxu1 %v4183_v62  ;;  %v4186_v25 = vld [vmem:[#allocation8_spill] sm:$0xff] }
 0x356   :  { %v1143_v62 = vunpack.c.l.bf16 %v4186_v25  ;;  %v1144_v8 = vunpack.c.h.bf16 %v4186_v25 }
 0x3f7   :  { %v1180_v38 = vpop.f32.mrf.mxu0  ;;  %v1221_v39 = vpop.f32.mrf.mxu1 }
 0x3f8   :  { %v1228_v40 = vadd.f32 %v1180_v38, %v1141_v37  ;;  %v1230_v19 = vadd.f32 %v1221_v39, %v1143_v62  ;;  %v3675_v37 = vld [vmem:[%s4144_s3 + $0xc0] ss:$16 sps:$4 sm:$0xff]   ;;  %v3681_v38 = vld [vmem:[%s4144_s3 + $0xc8] ss:$16 sps:$4 sm:$0xff]   ;;  %v3687_v39 = vld [vmem:[%s4144_s3 + $0xa4] ss:$16 sps:$4 sm:$0xff]  }
 0x3f9   :  { %v1182_v42 = vpop.f32.mrf.mxu0  ;;  %v1223_v43 = vpop.f32.mrf.mxu1 }
 0x3fa   :  { %v2465_v45 = vmul.f32 -1.442695, %v1228_v40  ;;  %v1229_v46 = vadd.f32 %v1182_v42, %v1142_v41  ;;  %v2467_v29 = vmul.f32 -1.442695, %v1230_v19  ;;  %v1231_v12 = vadd.f32 %v1223_v43, %v1144_v8  ;;  %v3693_v40 = vld [vmem:[%s4144_s3 + $0xac] ss:$16 sps:$4 sm:$0xff]  }
 0x3fb   :  { %v1184_v47 = vpop.f32.mrf.mxu0  ;;  %v1225_v48 = vpop.f32.mrf.mxu1  ;;  %v3699_v41 = vld [vmem:[%s4144_s3 + $0xa0] ss:$16 sps:$4 sm:$0xff]   ;;  %v3705_v42 = vld [vmem:[%s4144_s3 + $0xa8] ss:$16 sps:$4 sm:$0xff]   ;;  %v3711_v43 = vld [vmem:[%s4144_s3 + $0x84] ss:$16 sps:$4 sm:$0xff]  }
 0x3fc   :  { %2836 = vpow2.f32 %v2465_v45  ;;  %v2466_v49 = vmul.f32 -1.442695, %v1229_v46  ;;  %v3717_v45 = vld [vmem:[%s4144_s3 + $0x8c] ss:$16 sps:$4 sm:$0xff]   ;;  %v3723_v46 = vld [vmem:[%s4144_s3 + $0x80] ss:$16 sps:$4 sm:$0xff]  }
 0x3fd   :  { %v1185_v50 = vpop.f32.mrf.mxu0  ;;  %v1226_v31 = vpop.f32.mrf.mxu1  ;;  %v3730_v47 = vld [vmem:[%s4144_s3 + $0x64] ss:$16 sps:$4 sm:$0xff]  }
 0x3fe   :  { %2838 = vpow2.f32 %v2466_v49  ;;  %v4188_v49 = vld [vmem:[#allocation10_spill] sm:$0xff] }
 0x3ff   :  { %2840 = vpow2.f32 %v2467_v29  ;;  %v1261_v50 = vunpack.c.l.bf16 %v4188_v49  ;;  %v1262_v25 = vunpack.c.h.bf16 %v4188_v49 }
 0x400   :  { %2842 = vtanh.f32 %v1231_v12 }
 0x409   :  { %v2837_v33 = vpop.eup %2836 }
 0x40a   :  { %v1241_v14 = vadd.f32 1.0, %v2837_v33 }
 0x40b   :  { %v2839_v24 = vpop.eup %2838 }
 0x40c   :  { %2844 = vrcp.f32 %v1241_v14  ;;  %v1242_v34 = vadd.f32 1.0, %v2839_v24  ;;  %v2841_v35 = vpop.eup %2840 }
 0x40d   :  { %v2843_v1 = vpop.eup %2842  ;;  %v1243_v22 = vadd.f32 1.0, %v2841_v35 }
 0x40e   :  { %2846 = vrcp.f32 %v1242_v34 }
 0x40f   :  { %2848 = vrcp.f32 %v1243_v22 }
 0x419   :  { %v2845_v11 = vpop.eup %2844 }
 0x41a   :  { %v1252_v26 = vmul.f32 %v2845_v11, %v2843_v1 }
 0x41b   :  { %v2847_v23 = vpop.eup %2846 }
 0x41c   :  { %v1251_v28 = vmul.f32 %v2847_v23, %v3594_v30  ;;  %v2849_v13 = vpop.eup %2848  ;;  %v3655_v30 = vld [vmem:[%s4144_s3 + $0xe8] ss:$16 sps:$4 sm:$0xff]  }
 0x41e   :  { %v3640_v20 = vadd.f32 %v1252_v26, %v1251_v28 }
 0x420   :  { %2850 = vtanh.f32 %v3640_v20 }
 0x42d   :  { %v2851_v10 = vpop.eup %2850 }
 0x42e   :  { %v1255_v16 = vmul.f32 %v2851_v10, %v2849_v13 }
 0x430   :  { %v3644_v18 = vadd.f32 %v1255_v16, %v3599_v27  ;;  %v1263_v9 = vpack.c.bf16 %v1255_v16, %v1255_v16  ;;  %v3661_v27 = vld [vmem:[%s4144_s3 + $0xc4] ss:$16 sps:$4 sm:$0xff]  }
 0x432   :  { %1297 = vmatmul.mubr.bf16.vlgmr.msra.gmra.mxu0 %v1263_v9  ;;  %1338 = vmatmul.mubr.bf16.vlgmr.msra.gmra.mxu1 %v1263_v9  ;;  %v3802_v9 = vld [vmem:[%s4144_s3 + $0x60] ss:$16 sps:$4 sm:$0xff]  }
 0x433   :  { %1383 = vmatpush1.bf16.msra.mxu0 %v3649_v6  ;;  %1424 = vmatpush1.bf16.msra.mxu1 %v3655_v30 }
 0x434   :  { %1384 = vmatprep.subr.bf16.mxu0 %v3661_v27  ;;  %1425 = vmatprep.subr.bf16.mxu1 %v3667_v36 }
 0x435   :  { %1414 = vmatprep.mubr.bf16.mxu0 %v4181_v21  ;;  %1455 = vmatprep.mubr.bf16.mxu1 %v4181_v21 }
 0x437   :  { %1385 = vmatpush1.bf16.msra.mxu0 %v3675_v37  ;;  %1426 = vmatpush1.bf16.msra.mxu1 %v3681_v38 }
 0x438   :  { %1386 = vmatprep.subr.bf16.mxu0 %v3687_v39  ;;  %1427 = vmatprep.subr.bf16.mxu1 %v3693_v40 }
 0x43b   :  { %1387 = vmatpush1.bf16.msra.mxu0 %v3699_v41  ;;  %1428 = vmatpush1.bf16.msra.mxu1 %v3705_v42 }
 0x43c   :  { %1388 = vmatprep.subr.bf16.mxu0 %v3711_v43  ;;  %1429 = vmatprep.subr.bf16.mxu1 %v3717_v45 }
 0x43f   :  { %1389 = vmatpush1.bf16.msra.mxu0 %v3723_v46  ;;  %1430 = vmatpush1.bf16.msra.mxu1 %v3196_v51  ;;  %v3751_v51 = vld [vmem:[%s4144_s3 + $0xe4] ss:$16 sps:$4 sm:$0xff]  }
 0x440   :  { %1390 = vmatprep.subr.bf16.mxu0 %v3730_v47  ;;  %1431 = vmatprep.subr.bf16.mxu1 %v3203_v52  ;;  %v3757_v52 = vld [vmem:[%s4144_s3 + $0xec] ss:$16 sps:$4 sm:$0xff]  }
 0x443   :  { %1391 = vmatpush1.bf16.msra.mxu0 %v3215_v54  ;;  %1432 = vmatpush1.bf16.msra.mxu1 %v3220_v55  ;;  %v4187_v54 = vld [vmem:[#allocation9_spill] sm:$0xff] }
 0x444   :  { %1392 = vmatprep.subr.bf16.mxu0 %v3227_v56  ;;  %1433 = vmatprep.subr.bf16.mxu1 %v3232_v57  ;;  %v1259_v55 = vunpack.c.l.bf16 %v4187_v54 }
 0x447   :  { %1393 = vmatpush1.bf16.msra.mxu0 %v3239_v58  ;;  %1434 = vmatpush1.bf16.msra.mxu1 %v3244_v59  ;;  %v1260_v59 = vunpack.c.h.bf16 %v4187_v54  ;;  %v3808_v54 = vld [vmem:[%s4144_s3 + $0x68] ss:$16 sps:$4 sm:$0xff]  }
 0x448   :  { %1394 = vmatprep.subr.bf16.mxu0 %v3251_v60  ;;  %1435 = vmatprep.subr.bf16.mxu1 %v3256_v61 }
 0x44b   :  { %1395 = vmatpush1.bf16.msra.mxu0 %v3268_v63  ;;  %1436 = vmatpush1.bf16.msra.mxu1 %v3273_v0 }
 0x44c   :  { %1396 = vmatprep.subr.bf16.mxu0 %v3280_v2  ;;  %1437 = vmatprep.subr.bf16.mxu1 %v3285_v3 }
 0x44f   :  { %1397 = vmatpush1.bf16.msra.mxu0 %v3292_v4  ;;  %1438 = vmatpush1.bf16.msra.mxu1 %v3297_v5 }
 0x450   :  { %1500 = vmatprep.subr.bf16.mxu0 %v3751_v51  ;;  %1541 = vmatprep.subr.bf16.mxu1 %v3757_v52 }
 0x4f2   :  { %v1298_v56 = vpop.f32.mrf.mxu0  ;;  %v1339_v57 = vpop.f32.mrf.mxu1 }
 0x4f3   :  { %v1346_v58 = vadd.f32 %v1298_v56, %v1259_v55  ;;  %v1348_v31 = vadd.f32 %v1339_v57, %v1261_v50  ;;  %v3814_v55 = vld [vmem:[%s4144_s3 + $0x44] ss:$16 sps:$4 sm:$0xff]   ;;  %v3820_v56 = vld [vmem:[%s4144_s3 + $0x4c] ss:$16 sps:$4 sm:$0xff]   ;;  %v3826_v57 = vld [vmem:[%s4144_s3 + $0x40] ss:$16 sps:$4 sm:$0xff]  }
 0x4f4   :  { %v1300_v60 = vpop.f32.mrf.mxu0  ;;  %v1341_v61 = vpop.f32.mrf.mxu1 }
 0x4f5   :  { %v2468_v63 = vmul.f32 -1.442695, %v1346_v58  ;;  %v1347_v0 = vadd.f32 %v1300_v60, %v1260_v59  ;;  %v2470_v62 = vmul.f32 -1.442695, %v1348_v31  ;;  %v1349_v19 = vadd.f32 %v1341_v61, %v1262_v25  ;;  %v3832_v58 = vld [vmem:[%s4144_s3 + $0x48] ss:$16 sps:$4 sm:$0xff]  }
 0x4f6   :  { %v1302_v2 = vpop.f32.mrf.mxu0  ;;  %v1343_v3 = vpop.f32.mrf.mxu1  ;;  %v3838_v59 = vld [vmem:[%s4144_s3 + $0x24] ss:$16 sps:$4 sm:$0xff]   ;;  %v3844_v60 = vld [vmem:[%s4144_s3 + $0x2c] ss:$16 sps:$4 sm:$0xff]   ;;  %v3850_v61 = vld [vmem:[%s4144_s3 + $0x20] ss:$16 sps:$4 sm:$0xff]   ;;  %v1378_v31 = vunpack.c.h.bf16 %v3473_v15 }
 0x4f7   :  { %2852 = vpow2.f32 %v2468_v63  ;;  %v2469_v4 = vmul.f32 -1.442695, %v1347_v0  ;;  %v3856_v63 = vld [vmem:[%s4144_s3 + $0x28] ss:$16 sps:$4 sm:$0xff]   ;;  %v3862_v0 = vld [vmem:[%s4144_s3 + $0x4] ss:$16 sps:$4 sm:$0xff]  }
 0x4f8   :  { %v1303_v5 = vpop.f32.mrf.mxu0  ;;  %v1344_v48 = vpop.f32.mrf.mxu1  ;;  %v3868_v2 = vld [vmem:[%s4144_s3 + $0xc] ss:$16 sps:$4 sm:$0xff]   ;;  %v3874_v3 = vld [vmem:[%s4144_s3] ss:$16 sps:$4 sm:$0xff]  }
 0x4f9   :  { %2854 = vpow2.f32 %v2469_v4  ;;  %v3880_v4 = vld [vmem:[%s4144_s3 + $0x8] ss:$16 sps:$4 sm:$0xff]   ;;  %v1377_v5 = vunpack.c.l.bf16 %v3473_v15 }
 0x4fa   :  { %2856 = vpow2.f32 %v2470_v62 }
 0x4fb   :  { %2858 = vtanh.f32 %v1349_v19 }
 0x504   :  { %v2853_v8 = vpop.eup %2852 }
 0x505   :  { %v1359_v29 = vadd.f32 1.0, %v2853_v8 }
 0x506   :  { %v2855_v12 = vpop.eup %2854 }
 0x507   :  { %2860 = vrcp.f32 %v1359_v29  ;;  %v1360_v33 = vadd.f32 1.0, %v2855_v12  ;;  %v2857_v14 = vpop.eup %2856 }
 0x508   :  { %v2859_v24 = vpop.eup %2858  ;;  %v1361_v11 = vadd.f32 1.0, %v2857_v14 }
 0x509   :  { %2862 = vrcp.f32 %v1360_v33 }
 0x50a   :  { %2864 = vrcp.f32 %v1361_v11 }
 0x514   :  { %v2861_v34 = vpop.eup %2860 }
 0x515   :  { %v1370_v35 = vmul.f32 %v2861_v34, %v2859_v24  ;;  %v1380_v34 = vunpack.c.h.bf16 %v3478_v32 }
 0x516   :  { %v2863_v1 = vpop.eup %2862 }
 0x517   :  { %v1369_v26 = vmul.f32 %v2863_v1, %v3640_v20  ;;  %v2865_v22 = vpop.eup %2864  ;;  %v3789_v20 = vld [vmem:[%s4144_s3 + $0x88] ss:$16 sps:$4 sm:$0xff]  }
 0x519   :  { %v3765_v23 = vadd.f32 %v1370_v35, %v1369_v26 }
 0x51b   :  { %2866 = vtanh.f32 %v3765_v23 }
 0x528   :  { %v2867_v28 = vpop.eup %2866 }
 0x529   :  { %v1373_v13 = vmul.f32 %v2867_v28, %v2865_v22 }
 0x52b   :  { %v1381_v10 = vpack.c.bf16 %v1373_v13, %v1373_v13  ;;  %v3769_v16 = vadd.f32 %v1373_v13, %v3644_v18  ;;  %v3796_v18 = vld [vmem:[%s4144_s3 + $0x6c] ss:$16 sps:$4 sm:$0xff]  }
 0x52d   :  { %1415 = vmatmul.mubr.bf16.vlgmr.msra.gmra.mxu0 %v1381_v10  ;;  %1456 = vmatmul.mubr.bf16.vlgmr.msra.gmra.mxu1 %v1381_v10 }
 0x52e   :  { %1501 = vmatpush1.bf16.msra.mxu0 %v3649_v6  ;;  %1542 = vmatpush1.bf16.msra.mxu1 %v3655_v30 }
 0x52f   :  { %1502 = vmatprep.subr.bf16.mxu0 %v3661_v27  ;;  %1543 = vmatprep.subr.bf16.mxu1 %v3667_v36 }
 0x530   :  { %1532 = vmatprep.mubr.bf16.mxu0 %v4181_v21  ;;  %1573 = vmatprep.mubr.bf16.mxu1 %v4181_v21 }
 0x532   :  { %1503 = vmatpush1.bf16.msra.mxu0 %v3675_v37  ;;  %1544 = vmatpush1.bf16.msra.mxu1 %v3681_v38 }
 0x533   :  { %1504 = vmatprep.subr.bf16.mxu0 %v3687_v39  ;;  %1545 = vmatprep.subr.bf16.mxu1 %v3693_v40 }
 0x536   :  { %1505 = vmatpush1.bf16.msra.mxu0 %v3699_v41  ;;  %1546 = vmatpush1.bf16.msra.mxu1 %v3705_v42 }
 0x537   :  { %1506 = vmatprep.subr.bf16.mxu0 %v3711_v43  ;;  %1547 = vmatprep.subr.bf16.mxu1 %v3717_v45 }
 0x53a   :  { %1507 = vmatpush1.bf16.msra.mxu0 %v3723_v46  ;;  %1548 = vmatpush1.bf16.msra.mxu1 %v3789_v20 }
 0x53b   :  { %1508 = vmatprep.subr.bf16.mxu0 %v3730_v47  ;;  %1549 = vmatprep.subr.bf16.mxu1 %v3796_v18 }
 0x53e   :  { %1509 = vmatpush1.bf16.msra.mxu0 %v3802_v9  ;;  %1550 = vmatpush1.bf16.msra.mxu1 %v3808_v54 }
 0x53f   :  { %1510 = vmatprep.subr.bf16.mxu0 %v3814_v55  ;;  %1551 = vmatprep.subr.bf16.mxu1 %v3820_v56 }
 0x542   :  { %1511 = vmatpush1.bf16.msra.mxu0 %v3826_v57  ;;  %1552 = vmatpush1.bf16.msra.mxu1 %v3832_v58 }
 0x543   :  { %1512 = vmatprep.subr.bf16.mxu0 %v3838_v59  ;;  %1553 = vmatprep.subr.bf16.mxu1 %v3844_v60 }
 0x546   :  { %1513 = vmatpush1.bf16.msra.mxu0 %v3850_v61  ;;  %1554 = vmatpush1.bf16.msra.mxu1 %v3856_v63 }
 0x547   :  { %1514 = vmatprep.subr.bf16.mxu0 %v3862_v0  ;;  %1555 = vmatprep.subr.bf16.mxu1 %v3868_v2 }
 0x54a   :  { %1515 = vmatpush1.bf16.msra.mxu0 %v3874_v3  ;;  %1556 = vmatpush1.bf16.msra.mxu1 %v3880_v4 }
 0x54b   :  { %1618 = vmatprep.subr.bf16.mxu0 %v3751_v51  ;;  %1659 = vmatprep.subr.bf16.mxu1 %v3757_v52  ;;  %v1379_v51 = vunpack.c.l.bf16 %v3478_v32 }
 0x5ed   :  { %v1416_v48 = vpop.f32.mrf.mxu0  ;;  %v1457_v49 = vpop.f32.mrf.mxu1 }
 0x5ee   :  { %v1464_v50 = vadd.f32 %v1416_v48, %v1377_v5  ;;  %v1466_v52 = vadd.f32 %v1457_v49, %v1379_v51  ;;  %v2752_v51 = vld [vmem:[%s4146_s5 + $0x68] sm:$0xff]  }
 0x5ef   :  { %v1418_v25 = vpop.f32.mrf.mxu0  ;;  %v1459_v62 = vpop.f32.mrf.mxu1 }
 0x5f0   :  { %v2471_v19 = vmul.f32 -1.442695, %v1464_v50  ;;  %v1465_v8 = vadd.f32 %v1418_v25, %v1378_v31  ;;  %v2473_v35 = vmul.f32 -1.442695, %v1466_v52  ;;  %v1467_v1 = vadd.f32 %v1459_v62, %v1380_v34  ;;  %v2753_v52 = vld [vmem:[%s4146_s5 + $0x28] sm:$0xff]   ;;  %v2754_v34 = vld [vmem:[%s4146_s5 + $0x60] sm:$0xff]  }
 0x5f1   :  { %v1420_v29 = vpop.f32.mrf.mxu0  ;;  %v1461_v12 = vpop.f32.mrf.mxu1 }
 0x5f2   :  { %2868 = vpow2.f32 %v2471_v19  ;;  %v2472_v33 = vmul.f32 -1.442695, %v1465_v8  ;;  %v2748_v12 = vld [vmem:[%s4146_s5 + $0x78] sm:$0xff]  }
 0x5f3   :  { %v1421_v14 = vpop.f32.mrf.mxu0  ;;  %v1462_v24 = vpop.f32.mrf.mxu1 }
 0x5f4   :  { %2870 = vpow2.f32 %v2472_v33  ;;  %v2749_v33 = vld [vmem:[%s4146_s5 + $0x38] sm:$0xff]   ;;  %v2750_v14 = vld [vmem:[%s4146_s5 + $0x70] sm:$0xff]  }
 0x5f5   :  { %2872 = vpow2.f32 %v2473_v35  ;;  %v2751_v24 = vld [vmem:[%s4146_s5 + $0x30] sm:$0xff]   ;;  %v2755_v35 = vld [vmem:[%s4146_s5 + $0x20] sm:$0xff]  }
 0x5f6   :  { %2874 = vtanh.f32 %v1467_v1  ;;  %v2756_v1 = vld [vmem:[%s4146_s5 + $0x58] sm:$0xff]  }
 0x5ff   :  { %v2869_v11 = vpop.eup %2868 }
 0x600   :  { %v1477_v15 = vadd.f32 1.0, %v2869_v11  ;;  %v2757_v11 = vld [vmem:[%s4146_s5 + $0x18] sm:$0xff]  }
 0x601   :  { %v2871_v26 = vpop.eup %2870 }
 0x602   :  { %2876 = vrcp.f32 %v1477_v15  ;;  %v1478_v22 = vadd.f32 1.0, %v2871_v26  ;;  %v2873_v28 = vpop.eup %2872  ;;  %v2758_v15 = vld [vmem:[%s4146_s5 + $0x50] sm:$0xff]  }
 0x603   :  { %v2875_v13 = vpop.eup %2874  ;;  %v1479_v50 = vadd.f32 1.0, %v2873_v28  ;;  %v2759_v26 = vld [vmem:[%s4146_s5 + $0x10] sm:$0xff]   ;;  %v2761_v28 = vld [vmem:[%s4146_s5 + $0x8] sm:$0xff]  }
 0x604   :  { %2878 = vrcp.f32 %v1478_v22  ;;  %v2760_v22 = vld [vmem:[%s4146_s5 + $0x48] sm:$0xff]  }
 0x605   :  { %2880 = vrcp.f32 %v1479_v50  ;;  %v2953_v50 = vmov 0.0  }
 0x60f   :  { %v2877_v10 = vpop.eup %2876 }
 0x610   :  { %v1488_v5 = vmul.f32 %v2877_v10, %v2875_v13  ;;  %v2762_v13 = vld [vmem:[%s4146_s5 + $0x40] sm:$0xff]  }
 0x611   :  { %v2879_v48 = vpop.eup %2878  ;;  %v2763_v10 = vld [vmem:[%s4146_s5] sm:$0xff]  }
 0x612   :  { %v1487_v49 = vmul.f32 %v2879_v48, %v3765_v23  ;;  %v2881_v32 = vpop.eup %2880  ;;  %v2765_v48 = vld [vmem:[%s4146_s5 + $0xb0] sm:$0xff]  }
 0x614   :  { %v3890_v31 = vadd.f32 %v1488_v5, %v1487_v49  ;;  %v2764_v5 = vld [vmem:[%s4146_s5 + $0xb8] sm:$0xff]   ;;  %v2766_v49 = vld [vmem:[%s4146_s5 + $0xa8] sm:$0xff]  }
 0x616   :  { %2882 = vtanh.f32 %v3890_v31 }
 0x623   :  { %v2883_v25 = vpop.eup %2882 }
 0x624   :  { %v1491_v62 = vmul.f32 %v2883_v25, %v2881_v32  ;;  %v2768_v32 = vld [vmem:[%s4146_s5 + $0x98] sm:$0xff]   ;;  %v1731_v25 = vld [vmem:[%s4147_s1] sm:$0x7] }
 0x626   :  { %v1499_v19 = vpack.c.bf16 %v1491_v62, %v1491_v62  ;;  %v3894_v8 = vadd.f32 %v1491_v62, %v3769_v16  ;;  %v1498_v16 = vunpack.c.h.bf16 %v3490_v7  ;;  %v1732_v62 = vld [vmem:[%s4147_s1 + $0x4] sm:$0x7] }
 0x628   :  { %1533 = vmatmul.mubr.bf16.vlgmr.msra.gmra.mxu0 %v1499_v19  ;;  %1574 = vmatmul.mubr.bf16.vlgmr.msra.gmra.mxu1 %v1499_v19  ;;  %v1739_v19 = vunpack.c.l.bf16 %v1731_v25 }
 0x629   :  { %1619 = vmatpush1.bf16.msra.mxu0 %v3649_v6  ;;  %1660 = vmatpush1.bf16.msra.mxu1 %v3655_v30 }
 0x62a   :  { %1620 = vmatprep.subr.bf16.mxu0 %v3661_v27  ;;  %1661 = vmatprep.subr.bf16.mxu1 %v3667_v36  ;;  %v1496_v36 = vunpack.c.h.bf16 %v3485_v17 }
 0x62b   :  { %1650 = vmatprep.mubr.bf16.mxu0 %v4181_v21  ;;  %1691 = vmatprep.mubr.bf16.mxu1 %v4181_v21  ;;  %v1495_v21 = vunpack.c.l.bf16 %v3485_v17 }
 0x62d   :  { %1621 = vmatpush1.bf16.msra.mxu0 %v3675_v37  ;;  %1662 = vmatpush1.bf16.msra.mxu1 %v3681_v38 }
 0x62e   :  { %1622 = vmatprep.subr.bf16.mxu0 %v3687_v39  ;;  %1663 = vmatprep.subr.bf16.mxu1 %v3693_v40 }
 0x631   :  { %1623 = vmatpush1.bf16.msra.mxu0 %v3699_v41  ;;  %1664 = vmatpush1.bf16.msra.mxu1 %v3705_v42 }
 0x632   :  { %1624 = vmatprep.subr.bf16.mxu0 %v3711_v43  ;;  %1665 = vmatprep.subr.bf16.mxu1 %v3717_v45 }
 0x635   :  { %1625 = vmatpush1.bf16.msra.mxu0 %v3723_v46  ;;  %1666 = vmatpush1.bf16.msra.mxu1 %v3789_v20 }
 0x636   :  { %1626 = vmatprep.subr.bf16.mxu0 %v3730_v47  ;;  %1667 = vmatprep.subr.bf16.mxu1 %v3796_v18  ;;  %v1497_v47 = vunpack.c.l.bf16 %v3490_v7 }
 0x639   :  { %1627 = vmatpush1.bf16.msra.mxu0 %v3802_v9  ;;  %1668 = vmatpush1.bf16.msra.mxu1 %v3808_v54 }
 0x63a   :  { %1628 = vmatprep.subr.bf16.mxu0 %v3814_v55  ;;  %1669 = vmatprep.subr.bf16.mxu1 %v3820_v56 }
 0x63d   :  { %1629 = vmatpush1.bf16.msra.mxu0 %v3826_v57  ;;  %1670 = vmatpush1.bf16.msra.mxu1 %v3832_v58 }
 0x63e   :  { %1630 = vmatprep.subr.bf16.mxu0 %v3838_v59  ;;  %1671 = vmatprep.subr.bf16.mxu1 %v3844_v60 }
 0x641   :  { %1631 = vmatpush1.bf16.msra.mxu0 %v3850_v61  ;;  %1672 = vmatpush1.bf16.msra.mxu1 %v3856_v63 }
 0x642   :  { %1632 = vmatprep.subr.bf16.mxu0 %v3862_v0  ;;  %1673 = vmatprep.subr.bf16.mxu1 %v3868_v2 }
 0x645   :  { %1633 = vmatpush1.bf16.msra.mxu0 %v3874_v3  ;;  %1674 = vmatpush1.bf16.msra.mxu1 %v3880_v4 }
 0x646   :  { %2536 = vmatprep.subr.bf16.mxu0 %v2748_v12  ;;  %2585 = vmatprep.subr.bf16.mxu1 %v2953_v50 }
 0x6e8   :  { %v1534_v6 = vpop.f32.mrf.mxu0  ;;  %v1575_v30 = vpop.f32.mrf.mxu1 }
 0x6e9   :  { %v1582_v27 = vadd.f32 %v1534_v6, %v1495_v21  ;;  %v1584_v23 = vadd.f32 %v1575_v30, %v1497_v47  ;;  %v1740_v21 = vunpack.c.l.bf16 %v1732_v62  ;;  %v1613_v6 = vunpack.c.l.bf16 %v3494_v44  ;;  %v1734_v30 = vld [vmem:[%s4147_s1 + $0xc] sm:$0x7] }
 0x6ea   :  { %v1536_v37 = vpop.f32.mrf.mxu0  ;;  %v1577_v38 = vpop.f32.mrf.mxu1 }
 0x6eb   :  { %v2474_v39 = vmul.f32 -1.442695, %v1582_v27  ;;  %v1583_v40 = vadd.f32 %v1536_v37, %v1496_v36  ;;  %v2476_v20 = vmul.f32 -1.442695, %v1584_v23  ;;  %v1585_v18 = vadd.f32 %v1577_v38, %v1498_v16 }
 0x6ec   :  { %v1538_v41 = vpop.f32.mrf.mxu0  ;;  %v1579_v42 = vpop.f32.mrf.mxu1  ;;  %v1748_v36 = vsel %vm1747_vm6, %v1739_v19, 0.0 }
 0x6ed   :  { %2884 = vpow2.f32 %v2474_v39  ;;  %v2475_v43 = vmul.f32 -1.442695, %v1583_v40  ;;  %v1755_v39 = vsel %vm1747_vm6, %v1740_v21, 0.0  ;;  %v1614_v41 = vunpack.c.h.bf16 %v3494_v44 }
 0x6ee   :  { %v1539_v45 = vpop.f32.mrf.mxu0  ;;  %v1580_v46 = vpop.f32.mrf.mxu1  ;;  %v1749_v47 = vrot.slane %v1748_v36, 4 }
 0x6ef   :  { %2886 = vpow2.f32 %v2475_v43  ;;  %v1735_v45 = vld [vmem:[%s4147_s1 + $0x10] sm:$0x7]  ;;  %v1742_v46 = vunpack.c.l.bf16 %v1734_v30 }
 0x6f0   :  { %2888 = vpow2.f32 %v2476_v20  ;;  %v1756_v20 = vrot.slane %v1755_v39, 4 }
 0x6f1   :  { %2890 = vtanh.f32 %v1585_v18 }
 0x6fa   :  { %v2885_v9 = vpop.eup %2884 }
 0x6fb   :  { %v1595_v17 = vadd.f32 1.0, %v2885_v9 }
 0x6fc   :  { %v2887_v54 = vpop.eup %2886 }
 0x6fd   :  { %2892 = vrcp.f32 %v1595_v17  ;;  %v1596_v55 = vadd.f32 1.0, %v2887_v54  ;;  %v2889_v56 = vpop.eup %2888  ;;  %v1736_v54 = vld [vmem:[%s4147_s1 + $0x14] sm:$0x7] }
 0x6fe   :  { %v2891_v57 = vpop.eup %2890  ;;  %v1597_v61 = vadd.f32 1.0, %v2889_v56 }
 0x6ff   :  { %2894 = vrcp.f32 %v1596_v55  ;;  %v1743_v55 = vunpack.c.l.bf16 %v1735_v45 }
 0x700   :  { %2896 = vrcp.f32 %v1597_v61  ;;  %v1744_v61 = vunpack.c.l.bf16 %v1736_v54 }
 0x70a   :  { %v2893_v58 = vpop.eup %2892 }
 0x70b   :  { %v1606_v59 = vmul.f32 %v2893_v58, %v2891_v57 }
 0x70c   :  { %v2895_v60 = vpop.eup %2894 }
 0x70d   :  { %v1605_v63 = vmul.f32 %v2895_v60, %v3890_v31  ;;  %v2897_v7 = vpop.eup %2896  ;;  %v2767_v31 = vld [vmem:[%s4146_s5 + $0xa0] sm:$0xff]   ;;  %v1737_v60 = vld [vmem:[%s4147_s1 + $0x18] sm:$0x7] }
 0x70e   :  { %v1745_v12 = vunpack.c.l.bf16 %v1737_v60 }
 0x70f   :  { %v3933_v0 = vadd.f32 %v1606_v59, %v1605_v63  ;;  %v1769_v59 = vsel %vm1747_vm6, %v1742_v46, 0.0  ;;  %v1750_v63 = vadd.f32 %v1749_v47, %v1748_v36 }
 0x711   :  { %2898 = vtanh.f32 %v3933_v0 }
 0x71e   :  { %v2899_v2 = vpop.eup %2898 }
 0x71f   :  { %v1609_v3 = vmul.f32 %v2899_v2, %v2897_v7  ;;  %v1757_v7 = vadd.f32 %v1756_v20, %v1755_v39  ;;  %v1615_v2 = vunpack.c.l.bf16 %v3498_v53 }
 0x721   :  { %v1617_v4 = vpack.c.bf16 %v1609_v3, %v1609_v3  ;;  %v3937_v29 = vadd.f32 %v1609_v3, %v3894_v8  ;;  %v1733_v8 = vld [vmem:[%s4147_s1 + $0x8] sm:$0x7]  ;;  %v1770_v3 = vrot.slane %v1769_v59, 4 }
 0x722   :  { %v1741_v27 = vunpack.c.l.bf16 %v1733_v8 }
 0x723   :  { %1651 = vmatmul.mubr.bf16.vlgmr.msra.gmra.mxu0 %v1617_v4  ;;  %1692 = vmatmul.mubr.bf16.vlgmr.msra.gmra.mxu1 %v1617_v4  ;;  %v1776_v4 = vsel %vm1747_vm6, %v1743_v55, 0.0 }
 0x724   :  { %2537 = vmatpush3.bf16.msra.mxu0 %v2749_v33  ;;  %2586 = vmatpush3.bf16.msra.mxu1 %v2764_v5  ;;  %v1762_v18 = vsel %vm1747_vm6, %v1741_v27, 0.0  ;;  %v1790_v5 = vsel %vm1747_vm6, %v1745_v12, 0.0 }
 0x725   :  { %2538 = vmatprep.subr.bf16.mxu0 %v2750_v14  ;;  %2587 = vmatprep.subr.bf16.mxu1 %v2953_v50  ;;  %v1763_v58 = vrot.slane %v1762_v18, 4  ;;  %v1791_v19 = vrot.slane %v1790_v5, 4 }
 0x726   :  { %2601 = vmatprep.mubr.msk.bf16.mxu1 %vm2954_vm14, %v2953_v50 }
 0x727   :  { %v1764_v33 = vadd.f32 %v1763_v58, %v1762_v18 }
 0x728   :  { %2539 = vmatpush3.bf16.msra.mxu0 %v2751_v24  ;;  %2588 = vmatpush3.bf16.msra.mxu1 %v2765_v48  ;;  %v1738_v24 = vld [vmem:[%s4147_s1 + $0x1c] sm:$0x7] }
 0x729   :  { %2540 = vmatprep.subr.bf16.mxu0 %v2752_v51  ;;  %2589 = vmatprep.subr.bf16.mxu1 %v2953_v50  ;;  %v1751_v51 = vrot.slane %v1750_v63, 2 }
 0x72c   :  { %2541 = vmatpush3.bf16.msra.mxu0 %v2753_v52  ;;  %2590 = vmatpush3.bf16.msra.mxu1 %v2766_v49  ;;  %v1758_v52 = vrot.slane %v1757_v7, 2 }
 0x72d   :  { %2542 = vmatprep.subr.bf16.mxu0 %v2754_v34  ;;  %2591 = vmatprep.subr.bf16.mxu1 %v2953_v50  ;;  %v1783_v34 = vsel %vm1747_vm6, %v1744_v61, 0.0 }
 0x730   :  { %2543 = vmatpush3.bf16.msra.mxu0 %v2755_v35  ;;  %2592 = vmatpush3.bf16.msra.mxu1 %v2767_v31  ;;  %v1777_v35 = vrot.slane %v1776_v4, 4 }
 0x731   :  { %2544 = vmatprep.subr.bf16.mxu0 %v2756_v1  ;;  %2593 = vmatprep.subr.bf16.mxu1 %v2953_v50  ;;  %v1771_v1 = vadd.f32 %v1770_v3, %v1769_v59 }
 0x732   :  { %v1778_v49 = vadd.f32 %v1777_v35, %v1776_v4 }
 0x733   :  { %v1772_v31 = vrot.slane %v1771_v1, 2 }
 0x734   :  { %2545 = vmatpush3.bf16.msra.mxu0 %v2757_v11  ;;  %2594 = vmatpush3.bf16.msra.mxu1 %v2768_v32  ;;  %v1616_v11 = vunpack.c.h.bf16 %v3498_v53  ;;  %v1779_v27 = vrot.slane %v1778_v49, 2 }
 0x735   :  { %2546 = vmatprep.subr.bf16.mxu0 %v2758_v15  ;;  %2595 = vmatprep.subr.bf16.mxu1 %v2953_v50  ;;  %v1746_v15 = vunpack.c.l.bf16 %v1738_v24 }
 0x736   :  { %v1780_v45 = vadd.f32 %v1779_v27, %v1778_v49 }
 0x737   :  { %v1797_v8 = vsel %vm1747_vm6, %v1746_v15, 0.0 }
 0x738   :  { %2547 = vmatpush3.bf16.msra.mxu0 %v2759_v26  ;;  %v1765_v26 = vrot.slane %v1764_v33, 2 }
 0x739   :  { %2548 = vmatprep.subr.bf16.mxu0 %v2760_v22  ;;  %v1784_v22 = vrot.slane %v1783_v34, 4 }
 0x73a   :  { %v1766_v25 = vadd.f32 %v1765_v26, %v1764_v33 }
 0x73b   :  { %v1785_v62 = vadd.f32 %v1784_v22, %v1783_v34 }
 0x73c   :  { %2549 = vmatpush3.bf16.msra.mxu0 %v2761_v28  ;;  %v1767_v39 = vrot.slane %v1766_v25, 1 }
 0x73d   :  { %2550 = vmatprep.subr.bf16.mxu0 %v2762_v13  ;;  %v1752_v13 = vadd.f32 %v1751_v51, %v1750_v63 }
 0x73f   :  { %v1753_v53 = vrot.slane %v1752_v13, 1 }
 0x740   :  { %2551 = vmatpush3.bf16.msra.mxu0 %v2763_v10  ;;  %v1759_v10 = vadd.f32 %v1758_v52, %v1757_v7 }
 0x741   :  { %2605 = vmatprep.subr.bf16.mxu0 %v2953_v50 }
 0x7e3   :  { %v1652_v37 = vpop.f32.mrf.mxu0  ;;  %v1693_v38 = vpop.f32.mrf.mxu1 }
 0x7e4   :  { %v1700_v40 = vadd.f32 %v1652_v37, %v1613_v6  ;;  %v1702_v14 = vadd.f32 %v1693_v38, %v1615_v2  ;;  %v1760_v6 = vrot.slane %v1759_v10, 1  ;;  %v1773_v37 = vadd.f32 %v1772_v31, %v1771_v1 }
 0x7e5   :  { %v1654_v42 = vpop.f32.mrf.mxu0  ;;  %v1695_v43 = vpop.f32.mrf.mxu1  ;;  %v1798_v38 = vrot.slane %v1797_v8, 4 }
 0x7e6   :  { %v2477_v23 = vmul.f32 -1.442695, %v1700_v40  ;;  %v1701_v16 = vadd.f32 %v1654_v42, %v1614_v41  ;;  %v2479_v28 = vmul.f32 -1.442695, %v1702_v14  ;;  %v1703_v48 = vadd.f32 %v1695_v43, %v1616_v11 }
 0x7e7   :  { %v1656_v9 = vpop.f32.mrf.mxu0  ;;  %v1697_v17 = vpop.f32.mrf.mxu1  ;;  %v1792_v40 = vadd.f32 %v1791_v19, %v1790_v5  ;;  %v1754_v41 = vadd.f32 %v1753_v53, %v1752_v13  ;;  %v1761_v42 = vadd.f32 %v1760_v6, %v1759_v10  ;;  %v1786_v43 = vrot.slane %v1785_v62, 2 }
 0x7e8   :  { %2900 = vpow2.f32 %v2477_v23  ;;  %v2478_v44 = vmul.f32 -1.442695, %v1701_v16  ;;  %v1774_v46 = vrot.slane %v1773_v37, 1  ;;  %v1799_v47 = vadd.f32 %v1798_v38, %v1797_v8 }
 0x7e9   :  { %v1657_v56 = vpop.f32.mrf.mxu0  ;;  %v1698_v57 = vpop.f32.mrf.mxu1  ;;  %v1768_v23 = vadd.f32 %v1767_v39, %v1766_v25  ;;  %v1793_v16 = vrot.slane %v1792_v40, 2  ;;  %v1787_v20 = vadd.f32 %v1786_v43, %v1785_v62  ;;  %v1805_v18 = vmul.f32 0.16666667, %v1754_v41 }
 0x7ea   :  { %2902 = vpow2.f32 %v2478_v44  ;;  %v1806_v9 = vmul.f32 0.16666667, %v1761_v42  ;;  %v1781_v17 = vrot.slane %v1780_v45, 1  ;;  %v1775_v54 = vadd.f32 %v1774_v46, %v1773_v37 }
 0x7eb   :  { %2904 = vpow2.f32 %v2479_v28  ;;  %v1800_v44 = vrot.slane %v1799_v47, 2  ;;  %v1794_v55 = vadd.f32 %v1793_v16, %v1792_v40  ;;  %v1807_v56 = vmul.f32 0.16666667, %v1768_v23  ;;  %v2770_v23 = vld [vmem:[%s4146_s5 + $0x88] sm:$0xff]   ;;  %v2772_v16 = vld [vmem:[%s4146_s5 + $0xf8] sm:$0xff]  }
 0x7ec   :  { %2906 = vtanh.f32 %v1703_v48  ;;  %v1788_v57 = vrot.slane %v1787_v20, 1  ;;  %v1813_v58 = vpack.c.bf16 %v1805_v18, %v1805_v18  ;;  %v1814_v59 = vpack.c.bf16 %v1806_v9, %v1806_v9  ;;  %v2774_v18 = vld [vmem:[%s4146_s5 + $0xe8] sm:$0xff]   ;;  %v2775_v9 = vld [vmem:[%s4146_s5 + $0xe0] sm:$0xff]  }
 0x7ed   :  { %v1782_v61 = vadd.f32 %v1781_v17, %v1780_v45  ;;  %v1801_v7 = vadd.f32 %v1800_v44, %v1799_v47  ;;  %v1808_v2 = vmul.f32 0.16666667, %v1775_v54  ;;  %v1795_v4 = vrot.slane %v1794_v55, 1  ;;  %v2769_v47 = vld [vmem:[%s4146_s5 + $0x90] sm:$0xff]   ;;  %v2776_v17 = vld [vmem:[%s4146_s5 + $0xd8] sm:$0xff]   ;;  %v1821_v44 = vld [vmem:[%s4148_s6] sm:$0xff] }
 0x7ee   :  { %v1815_v12 = vpack.c.bf16 %v1807_v56, %v1807_v56  ;;  %v1789_v14 = vadd.f32 %v1788_v57, %v1787_v20  ;;  %v1830_v24 = vunpack.c.l.b16 %v1813_v58  ;;  %v1831_v51 = vunpack.c.l.b16 %v1814_v59  ;;  %2596 = vmatpush3.bf16.msra.mxu1 %v2769_v47  ;;  %v2773_v20 = vld [vmem:[%s4146_s5 + $0xf0] sm:$0xff]  }
 0x7ef   :  { %v1809_v35 = vmul.f32 0.16666667, %v1782_v61  ;;  %v1802_v11 = vrot.slane %v1801_v7, 1  ;;  %v1816_v15 = vpack.c.bf16 %v1808_v2, %v1808_v2  ;;  %v1796_v26 = vadd.f32 %v1795_v4, %v1794_v55  ;;  %2597 = vmatprep.subr.bf16.mxu1 %v2953_v50  ;;  %v2777_v54 = vld [vmem:[%s4146_s5 + $0xd0] sm:$0xff]   ;;  %v2778_v4 = vld [vmem:[%s4146_s5 + $0xc8] sm:$0xff]  }
 0x7f0   :  { %v1832_v22 = vunpack.c.l.b16 %v1815_v12  ;;  %v1810_v13 = vmul.f32 0.16666667, %v1789_v14  ;;  %v1839_v10 = vsel %vm1838_vm7, %v1831_v51, %v1830_v24  ;;  %v4189_v56 = vld [vmem:[#allocation5_spill] sm:$0xff]  ;;  %v2779_v12 = vld [vmem:[%s4146_s5 + $0xc0] sm:$0xff]   ;;  %v2782_v24 = vld [vmem:[%s4146_s5 + $0x128] sm:$0xff]  }
 0x7f1   :  { %v1817_v5 = vpack.c.bf16 %v1809_v35, %v1809_v35  ;;  %v1803_v48 = vadd.f32 %v1802_v11, %v1801_v7  ;;  %v1833_v49 = vunpack.c.l.b16 %v1816_v15  ;;  %v1811_v31 = vmul.f32 0.16666667, %v1796_v26  ;;  %v2781_v14 = vld [vmem:[%s4146_s5 + $0x130] sm:$0xff]   ;;  %v2783_v51 = vld [vmem:[%s4146_s5 + $0x120] sm:$0xff]  }
 0x7f2   :  { %v1818_v25 = vpack.c.bf16 %v1810_v13, %v1810_v13  ;;  %2598 = vmatpush3.bf16.msra.mxu1 %v2770_v23  ;;  %v4190_v57 = vsub.s32 0, %v4189_v56  ;;  %v4191_v35 = vsub.s32 1, %v4189_v56 }
 0x7f3   :  { %v1834_v62 = vunpack.c.l.b16 %v1817_v5  ;;  %v1812_v19 = vmul.f32 0.16666667, %v1803_v48  ;;  %v1819_v8 = vpack.c.bf16 %v1811_v31, %v1811_v31  ;;  %2599 = vmatprep.subr.bf16.mxu1 %v2953_v50  ;;  %v2786_v5 = vld [vmem:[%s4146_s5 + $0x108] sm:$0xff]   ;;  %v2787_v48 = vld [vmem:[%s4146_s5 + $0x100] sm:$0xff]  }
 0x7f4   :  { %v1889_v58 = vrot.slane %v1821_v44, %v4190_v57 }
 0x7f5   :  { %v2901_v32 = vpop.eup %2900  ;;  %v1820_v6 = vpack.c.bf16 %v1812_v19, %v1812_v19 }
 0x7f6   :  { %v1713_v21 = vadd.f32 1.0, %v2901_v32  ;;  %v1841_v32 = vsel %vm1840_vm8, %v1832_v22, %v1839_v10 }
 0x7f7   :  { %v2903_v30 = vpop.eup %2902  ;;  %v1837_v37 = vunpack.c.l.b16 %v1820_v6 }
 0x7f8   :  { %2908 = vrcp.f32 %v1713_v21  ;;  %v1714_v36 = vadd.f32 1.0, %v2903_v30  ;;  %v2905_v60 = vpop.eup %2904  ;;  %v1835_v21 = vunpack.c.l.b16 %v1818_v25  ;;  %v1836_v30 = vunpack.c.l.b16 %v1819_v8 }
 0x7f9   :  { %v2907_v63 = vpop.eup %2906  ;;  %v1715_v34 = vadd.f32 1.0, %v2905_v60 }
 0x7fa   :  { %2910 = vrcp.f32 %v1714_v36 }
 0x7fb   :  { %2912 = vrcp.f32 %v1715_v34  ;;  %v2785_v34 = vld [vmem:[%s4146_s5 + $0x110] sm:$0xff]  }
 0x805   :  { %v2909_v3 = vpop.eup %2908 }
 0x806   :  { %v1724_v33 = vmul.f32 %v2909_v3, %v2907_v63 }
 0x807   :  { %v2911_v52 = vpop.eup %2910 }
 0x808   :  { %v1723_v1 = vmul.f32 %v2911_v52, %v3933_v0  ;;  %v1843_v0 = vsel %vm1842_vm9, %v1833_v49, %v1841_v32  ;;  %v2913_v36 = vpop.eup %2912  ;;  %v2784_v52 = vld [vmem:[%s4146_s5 + $0x118] sm:$0xff]   ;;  %v4192_v49 = vsub.s32 2, %v4189_v56 }
 0x809   :  { %v1845_v53 = vsel %vm1844_vm10, %v1834_v62, %v1843_v0 }
 0x80a   :  { %v1725_v28 = vadd.f32 %v1724_v33, %v1723_v1  ;;  %v1847_v27 = vsel %vm1846_vm11, %v1835_v21, %v1845_v53  ;;  %v2780_v33 = vld [vmem:[%s4146_s5 + $0x138] sm:$0xff]   ;;  %v2047_v1 = vrot.slane %v1821_v44, %v4191_v35  ;;  %v2157_v31 = vrot.slane %v1821_v44, %v4192_v49 }
 0x80b   :  { %v1849_v39 = vsel %vm1848_vm12, %v1836_v30, %v1847_v27  ;;  %v4193_v53 = vsub.s32 3, %v4189_v56  ;;  %v4194_v27 = vld [vmem:[#allocation6_spill] sm:$0xff] }
 0x80c   :  { %2914 = vtanh.f32 %v1725_v28  ;;  %v1851_v42 = vsel %vm1850_vm13, %v1837_v37, %v1849_v39  ;;  %vm2356_vm15 = vcmp.lt.s32.totalorder %v4194_v27, 4 }
 0x80d   :  { %v1852_v45 = vpack.c.b16 %v1851_v42, %v1851_v42  ;;  %v2267_v6 = vrot.slane %v1821_v44, %v4193_v53 }
 0x819   :  { %v2915_v38 = vpop.eup %2914 }
 0x81a   :  { %v1727_v40 = vmul.f32 %v2915_v38, %v2913_v36 }
 0x81c   :  { %v1728_v41 = vadd.f32 %v1727_v40, %v3937_v29  ;;  %v2771_v29 = vld [vmem:[%s4146_s5 + $0x80] sm:$0xff]  }
 0x81d   :  { %2600 = vmatpush3.bf16.msra.mxu1 %v2771_v29 }
 0x81e   :  { %v1729_v43 = vmul.f32 0.125, %v1728_v41  ;;  %2625 = vmatprep.subr.bf16.mxu1 %v2953_v50 }
 0x820   :  { %v1730_v46 = vpack.c.bf16 %v1729_v43, %v1729_v43 }
 0x822   :  { %2018 = vmatprep.mubr.bf16.mxu0 %v1730_v46 }
 0x823   :  { %2019 = vmatmul.mubr.bf16.vlgmr.msra.gmra.mxu0 %v1852_v45 }
 0x824   :  { %2621 = vmatprep.mubr.msk.bf16.mxu0 %vm2954_vm14, %v2953_v50  ;;  %2606 = vmatpush3.bf16.msra.mxu0 %v2772_v16 }
 0x825   :  { %2607 = vmatprep.subr.bf16.mxu0 %v2953_v50 }
 0x828   :  { %2608 = vmatpush3.bf16.msra.mxu0 %v2773_v20 }
 0x829   :  { %2609 = vmatprep.subr.bf16.mxu0 %v2953_v50 }
 0x82c   :  { %2610 = vmatpush3.bf16.msra.mxu0 %v2774_v18 }
 0x82d   :  { %2611 = vmatprep.subr.bf16.mxu0 %v2953_v50 }
 0x830   :  { %2612 = vmatpush3.bf16.msra.mxu0 %v2775_v9 }
 0x831   :  { %2613 = vmatprep.subr.bf16.mxu0 %v2953_v50 }
 0x834   :  { %2614 = vmatpush3.bf16.msra.mxu0 %v2776_v17 }
 0x835   :  { %2615 = vmatprep.subr.bf16.mxu0 %v2953_v50 }
 0x838   :  { %2616 = vmatpush3.bf16.msra.mxu0 %v2777_v54 }
 0x839   :  { %2617 = vmatprep.subr.bf16.mxu0 %v2953_v50 }
 0x83c   :  { %2618 = vmatpush3.bf16.msra.mxu0 %v2778_v4 }
 0x83d   :  { %2619 = vmatprep.subr.bf16.mxu0 %v2953_v50 }
 0x840   :  { %2620 = vmatpush3.bf16.msra.mxu0 %v2779_v12 }
 0x8e3   :  { %v2552_v55 = vpop.f32.mrf.mxu0 }
 0x8e5   :  { %v2553_v59 = vpop.f32.mrf.mxu0 }
 0x8e6   :  { %v2554_v60 = vadd.f32 %v2553_v59, %v2552_v55 }
 0x8e7   :  { %v2555_v61 = vpop.f32.mrf.mxu0 }
 0x8e8   :  { %v2021_v63 = vadd.f32 %v2554_v60, %v1889_v58 }
 0x8e9   :  { %v2556_v7 = vpop.f32.mrf.mxu0 }
 0x8ea   :  { %v2026_v2 = vmax.f32 %v2021_v63, 0.0 }
 0x8ec   :  { %v2027_v3 = vpack.c.bf16 %v2026_v2, %v2026_v2 }
 0x8ee   :  { %2602 = vmatmul.mubr.bf16.vlgmr.msra.gmra.mxu1 %v2027_v3 }
 0x8ef   :  { %2641 = vmatprep.mubr.msk.bf16.mxu1 %vm2954_vm14, %v2953_v50  ;;  %2626 = vmatpush3.bf16.msra.mxu1 %v2780_v33 }
 0x8f0   :  { %2627 = vmatprep.subr.bf16.mxu1 %v2953_v50 }
 0x8f3   :  { %2628 = vmatpush3.bf16.msra.mxu1 %v2781_v14 }
 0x8f4   :  { %2629 = vmatprep.subr.bf16.mxu1 %v2953_v50 }
 0x8f7   :  { %2630 = vmatpush3.bf16.msra.mxu1 %v2782_v24 }
 0x8f8   :  { %2631 = vmatprep.subr.bf16.mxu1 %v2953_v50 }
 0x8fb   :  { %2632 = vmatpush3.bf16.msra.mxu1 %v2783_v51 }
 0x8fc   :  { %2633 = vmatprep.subr.bf16.mxu1 %v2953_v50 }
 0x8ff   :  { %2634 = vmatpush3.bf16.msra.mxu1 %v2784_v52 }
 0x900   :  { %2635 = vmatprep.subr.bf16.mxu1 %v2953_v50 }
 0x903   :  { %2636 = vmatpush3.bf16.msra.mxu1 %v2785_v34 }
 0x904   :  { %2637 = vmatprep.subr.bf16.mxu1 %v2953_v50 }
 0x907   :  { %2638 = vmatpush3.bf16.msra.mxu1 %v2786_v5 }
 0x908   :  { %2639 = vmatprep.subr.bf16.mxu1 %v2953_v50 }
 0x90b   :  { %2640 = vmatpush3.bf16.msra.mxu1 %v2787_v48 }
 0x9ae   :  { %v2130_v11 = vpop.f32.mrf.mxu1 }
 0x9af   :  { %v2131_v15 = vadd.f32 %v2130_v11, %v2047_v1 }
 0x9b0   :  { %v2603_v26 = vpop.f32.mrf.mxu1 }
 0x9b1   :  { %v2136_v22 = vmax.f32 %v2131_v15, 0.0 }
 0x9b2   :  { %v2133_v28 = vpop.f32.mrf.mxu1 }
 0x9b3   :  { %v2137_v13 = vpack.c.bf16 %v2136_v22, %v2136_v22 }
 0x9b4   :  { %v2604_v10 = vpop.f32.mrf.mxu1 }
 0x9b5   :  { %2622 = vmatmul.mubr.bf16.vlgmr.msra.gmra.mxu0 %v2137_v13 }
 0xa75   :  { %v2240_v32 = vpop.f32.mrf.mxu0 }
 0xa76   :  { %v2241_v25 = vadd.f32 %v2240_v32, %v2157_v31 }
 0xa77   :  { %v2623_v62 = vpop.f32.mrf.mxu0 }
 0xa78   :  { %v2246_v19 = vmax.f32 %v2241_v25, 0.0 }
 0xa79   :  { %v2243_v0 = vpop.f32.mrf.mxu0 }
 0xa7a   :  { %v2247_v8 = vpack.c.bf16 %v2246_v19, %v2246_v19 }
 0xa7b   :  { %v2624_v21 = vpop.f32.mrf.mxu0 }
 0xa7c   :  { %2642 = vmatmul.mubr.bf16.vlgmr.msra.gmra.mxu1 %v2247_v8 }
 0xb3c   :  { %v2350_v30 = vpop.f32.mrf.mxu1 }
 0xb3d   :  { %v2351_v36 = vadd.f32 %v2350_v30, %v2267_v6 }
 0xb3e   :  { %v2643_v50 = vpop.f32.mrf.mxu1 }
 0xb3f   :  { %v2357_v37 = vsel %vm2356_vm15, %v2351_v36, -1e+30 }
 0xb40   :  { %2358 = vmax.xlane.f32.xlu0 %v2357_v37  ;;  %v2353_v38 = vpop.f32.mrf.mxu1 }
 0xb42   :  { %v2644_v39 = vpop.f32.mrf.mxu1 }
 0xbc9   :  { %v2359_v40 = vpop.xlane.xlu0 %2358 }
 0xbca   :  { %v2360_v41 = vsub.f32 %v2357_v37, %v2359_v40 }
 0xbcc   :  { %v2361_v42 = vmul.f32 1.442695, %v2360_v41 }
 0xbce   :  { %2916 = vpow2.f32 %v2361_v42 }
 0xbdb   :  { %v2917_v43 = vpop.eup %2916 }
 0xbdc   :  { %2363 = vadd.xlane.f32.xlu0 %v2917_v43 }
 0xc65   :  { %v2364_v45 = vpop.xlane.xlu0 %2363 }
 0xc66   :  { %2918 = vrcp.f32 %v2364_v45 }
 0xc73   :  { %v2919_v46 = vpop.eup %2918 }
 0xc74   :  { %v2366_v47 = vmul.f32 %v2919_v46, %v2917_v43 }
 0xc76   :  { %2367 = vst [vmem:[%s4149_s7] sm:$0xff] %v2366_v47 }

</bundles_post_ra>
